<compile_context>
chip_gen: v7x
topology: tpu7x:2x2x1
jax: 0.10.0
libtpu: 0.0.40
codegen_flags: <defaults>
</compile_context>

<pallas_src>
import functools

import jax
import jax.numpy as jnp
from jax.experimental import pallas as pl
from jax.experimental.pallas import tpu as pltpu

NEG_SLOPE = 0.2
BN_EPS = 1e-5
LANE = 128


def _lrelu(x):
    return jnp.where(x >= 0, x, NEG_SLOPE * x)


def _lane_tile(n, rows_a, rows_b, budget=8 * 1024 * 1024):
    """Largest lane tile (multiple of 128) dividing n whose double-buffered blocks
    fit a conservative VMEM budget; returns n itself when n is not lane-aligned."""
    if n % LANE != 0:
        return n
    best = LANE
    k = 1
    while k * LANE <= n:
        t = k * LANE
        if n % t == 0 and (rows_a + rows_b) * t * 4 * 2 <= budget:
            best = t
        k += 1
    return best


# ----------------------------- Linear + LeakyReLU -----------------------------
def _linear_lrelu_kernel(x_ref, w_ref, b_ref, o_ref):
    y = jnp.dot(x_ref[...], w_ref[...], preferred_element_type=jnp.float32)
    y = y + b_ref[...]
    o_ref[...] = _lrelu(y).astype(o_ref.dtype)


def linear_lrelu(x, w, b):
    B, L = x.shape
    M = w.shape[1]
    return pl.pallas_call(
        _linear_lrelu_kernel,
        out_shape=jax.ShapeDtypeStruct((B, M), jnp.float32),
        grid=(1,),
        in_specs=[
            pl.BlockSpec((B, L), lambda i: (0, 0)),
            pl.BlockSpec((L, M), lambda i: (0, 0)),
            pl.BlockSpec((1, M), lambda i: (0, 0)),
        ],
        out_specs=pl.BlockSpec((B, M), lambda i: (0, 0)),
    )(x, w, b.reshape(1, M))


# -------------- ConvTranspose2d: stride-phase decomposed tap-fused matmul ------
def _make_conv_kernel(activation):
    def kernel(p_ref, w_ref, b_ref, o_ref):
        # (Cout, T*Cin) @ (T*Cin, Nt): single fused-contraction MXU matmul.
        y = jnp.dot(w_ref[...], p_ref[0], preferred_element_type=jnp.float32)
        y = y + b_ref[...]
        if activation == "lrelu":
            y = _lrelu(y)
        elif activation == "tanh":
            y = jnp.tanh(y)
        o_ref[0] = y.astype(o_ref.dtype)

    return kernel


def _conv_phase_matmul(patches, w_eq, b, activation):
    B, TC, Np = patches.shape
    Cout = w_eq.shape[0]
    nt = _lane_tile(Np, TC, Cout)
    grid = (B, Np // nt)
    return pl.pallas_call(
        _make_conv_kernel(activation),
        out_shape=jax.ShapeDtypeStruct((B, Cout, Np), jnp.float32),
        grid=grid,
        in_specs=[
            pl.BlockSpec((1, TC, nt), lambda bi, ni: (bi, 0, ni)),
            pl.BlockSpec((Cout, TC), lambda bi, ni: (0, 0)),  # weight resident
            pl.BlockSpec((Cout, 1), lambda bi, ni: (0, 0)),
        ],
        out_specs=pl.BlockSpec((1, Cout, nt), lambda bi, ni: (bi, 0, ni)),
        compiler_params=pltpu.CompilerParams(
            dimension_semantics=("parallel", "parallel")
        ),
    )(patches, w_eq, b.reshape(Cout, 1))


def _phase_params(ph, K, s, p, H, Ho):
    """Parameters of one output phase along a single spatial axis."""
    taps = list(range(ph, K, s))                 # kernel positions kh with kh = ph (mod s)
    Th = len(taps)
    oh0 = (ph - p) % s                           # first output index with this phase
    Hq = len(range(oh0, Ho, s))                  # number of output rows of this phase
    q0 = (oh0 + p) // s
    pad_lo = max(0, (Th - 1) - q0)
    pad_hi = max(0, q0 + Hq - H)
    starts = [q0 - j + pad_lo for j in range(Th)]  # window start of tap j in padded input
    return taps, Hq, oh0, pad_lo, pad_hi, starts


def conv_transpose2d(x, w, b, stride, padding, activation=None):
    """PyTorch ConvTranspose2d semantics on a channel-first (B, Cin, H, W) input.

    Sub-pixel decomposition: output rows with (oh + p) % s == ph only receive
    kernel rows kh = ph + j*s from input rows ih = (oh + p)//s - j, so each of the
    s*s output phases is a dense correlation over the un-dilated input. The taps of
    a phase are fused into one (Cout, T*Cin) x (T*Cin, N) MXU contraction.
    """
    B, Cin, H, W = x.shape
    _, Cout, K, _ = w.shape
    s, p = stride, padding
    assert K >= s, "phase decomposition here assumes kernel_size >= stride"
    Ho = (H - 1) * s - 2 * p + K
    Wo = (W - 1) * s - 2 * p + K

    y = jnp.zeros((B, Cout, Ho, Wo), jnp.float32)
    for ph in range(s):
        taps_h, Hq, oh0, plo_h, phi_h, st_h = _phase_params(ph, K, s, p, H, Ho)
        for pw in range(s):
            taps_w, Wq, ow0, plo_w, phi_w, st_w = _phase_params(pw, K, s, p, W, Wo)
            if Hq == 0 or Wq == 0:
                continue
            Th, Tw = len(taps_h), len(taps_w)
            Nq = Hq * Wq

            # --- glue: pad (no zero insertion) and gather the T shifted windows ---
            xp = jnp.pad(x, ((0, 0), (0, 0), (plo_h, phi_h), (plo_w, phi_w)))
            wins = []
            for j in range(Th):
                for l in range(Tw):
                    win = xp[:, :, st_h[j]:st_h[j] + Hq, st_w[l]:st_w[l] + Wq]
                    wins.append(win.reshape(B, Cin, Nq))
            patches = jnp.concatenate(wins, axis=1)          # (B, Th*Tw*Cin, Nq)

            # lane-pad the spatial axis so stores stay lane-dense / tileable
            Np = Nq if Nq < LANE else (-(-Nq // LANE)) * LANE
            if Np != Nq:
                patches = jnp.pad(patches, ((0, 0), (0, 0), (0, Np - Nq)))

            # --- glue: matching equivalent weight slab (Cout, Th*Tw*Cin) ---
            w_sel = w[:, :, taps_h, :][:, :, :, taps_w]       # (Cin, Cout, Th, Tw)
            w_eq = jnp.transpose(w_sel, (1, 2, 3, 0)).reshape(Cout, Th * Tw * Cin)

            out_ph = _conv_phase_matmul(patches, w_eq, b, activation)
            out_ph = out_ph[:, :, :Nq].reshape(B, Cout, Hq, Wq)
            y = y.at[:, :, oh0::s, ow0::s].set(out_ph)
    return y


# ----------------------- BatchNorm2d (batch stats) + LeakyReLU ----------------
# Matches nn.BatchNorm2d in training mode (fresh module default): per-channel
# mean/var over (N, H, W), biased variance, eps=1e-5, affine gamma/beta.
# TODO(synk): running-stat buffer updates (a training-time side effect) are not modeled.
def _bn_stats_kernel(x_ref, sum_ref, ssq_ref):
    @pl.when((pl.program_id(0) == 0) & (pl.program_id(1) == 0))
    def _():
        sum_ref[...] = jnp.zeros_like(sum_ref)
        ssq_ref[...] = jnp.zeros_like(ssq_ref)

    x = x_ref[0]                                              # (C, Nt)
    sum_ref[...] += jnp.sum(x, axis=1, keepdims=True)
    ssq_ref[...] += jnp.sum(x * x, axis=1, keepdims=True)


def _bn_apply_kernel(x_ref, sc_ref, sh_ref, o_ref):
    y = x_ref[0] * sc_ref[...] + sh_ref[...]
    o_ref[0] = _lrelu(y).astype(o_ref.dtype)


def batchnorm_lrelu(x, gamma, beta):
    """BatchNorm2d (batch statistics) + LeakyReLU(0.2) on channel-first input."""
    B, C, H, W = x.shape
    N = H * W
    xf = x.reshape(B, C, N)
    nt = _lane_tile(N, C, C)
    grid = (B, N // nt)

    sums, ssqs = pl.pallas_call(
        _bn_stats_kernel,
        out_shape=(jax.ShapeDtypeStruct((C, 1), jnp.float32),
                   jax.ShapeDtypeStruct((C, 1), jnp.float32)),
        grid=grid,
        in_specs=[pl.BlockSpec((1, C, nt), lambda bi, ni: (bi, 0, ni))],
        out_specs=(pl.BlockSpec((C, 1), lambda bi, ni: (0, 0)),
                   pl.BlockSpec((C, 1), lambda bi, ni: (0, 0))),
        compiler_params=pltpu.CompilerParams(
            dimension_semantics=("arbitrary", "arbitrary")
        ),
    )(xf)

    cnt = float(B * N)
    mean = sums / cnt
    var = jnp.maximum(ssqs / cnt - mean * mean, 0.0)          # biased variance, f32
    scale = gamma.reshape(C, 1) * jax.lax.rsqrt(var + BN_EPS)
    shift = beta.reshape(C, 1) - mean * scale

    out = pl.pallas_call(
        _bn_apply_kernel,
        out_shape=jax.ShapeDtypeStruct((B, C, N), jnp.float32),
        grid=grid,
        in_specs=[
            pl.BlockSpec((1, C, nt), lambda bi, ni: (bi, 0, ni)),
            pl.BlockSpec((C, 1), lambda bi, ni: (0, 0)),
            pl.BlockSpec((C, 1), lambda bi, ni: (0, 0)),
        ],
        out_specs=pl.BlockSpec((1, C, nt), lambda bi, ni: (bi, 0, ni)),
        compiler_params=pltpu.CompilerParams(
            dimension_semantics=("parallel", "parallel")
        ),
    )(xf, scale, shift)
    return out.reshape(B, C, H, W)


# ------------------------------ Parameter setup --------------------------------
def spectral_normalize(w, u0, n_iters=10):
    # torch spectral_norm for ConvTranspose2d reshapes the weight with dim=1 (Cout):
    # W_mat has shape (Cout, Cin*K*K); sigma from power iteration.
    # TODO(synk): GConvTranspose2d source unavailable; power-iteration state/step
    # count approximated deterministically here (parameter preprocessing glue).
    Cin, Cout, K, _ = w.shape
    w_mat = jnp.transpose(w, (1, 0, 2, 3)).reshape(Cout, -1)
    u = u0 / (jnp.linalg.norm(u0) + 1e-12)
    v = None
    for _ in range(n_iters):
        v = w_mat.T @ u
        v = v / (jnp.linalg.norm(v) + 1e-12)
        u = w_mat @ v
        u = u / (jnp.linalg.norm(u) + 1e-12)
    sigma = u @ (w_mat @ v)
    return w / sigma


def init_params(key, cfg):
    latent = cfg["latent_dim"]
    ch = cfg["channels"]
    Oh, Ow = cfg["org_size"]
    ks = cfg["kernel_sizes"]
    keys = jax.random.split(key, 9)
    p = {}
    p["lin_w"] = 0.05 * jax.random.normal(keys[0], (latent, ch[0] * Oh * Ow), jnp.float32)
    p["lin_b"] = jnp.zeros((ch[0] * Oh * Ow,), jnp.float32)
    for i in range(4):
        cin, cout, k = ch[i], ch[i + 1], ks[i]
        w = 0.02 * jax.random.normal(keys[1 + 2 * i], (cin, cout, k, k), jnp.float32)
        u0 = jax.random.normal(keys[2 + 2 * i], (cout,), jnp.float32)
        p[f"conv{i}_w"] = spectral_normalize(w, u0)  # spec_norm=True
        p[f"conv{i}_b"] = jnp.zeros((cout,), jnp.float32)
        if i < 3:
            p[f"bn{i}_g"] = jnp.ones((cout,), jnp.float32)
            p[f"bn{i}_b"] = jnp.zeros((cout,), jnp.float32)
    return p


# --------------------------------- Forward -------------------------------------
def dcgan_generator_forward(noise, params, cfg):
    B = noise.shape[0]
    x = noise.reshape(B, -1)                                   # Flatten
    h = linear_lrelu(x, params["lin_w"], params["lin_b"])      # Linear + LeakyReLU(0.2)

    C0 = cfg["channels"][0]
    Oh, Ow = cfg["org_size"]
    # Reshape((C0, Oh, Ow)): plain row-major reshape, already channel-first (NCHW).
    h = h.reshape(B, C0, Oh, Ow)

    for i in range(4):
        last = i == 3
        h = conv_transpose2d(
            h,
            params[f"conv{i}_w"],
            params[f"conv{i}_b"],
            cfg["strides"][i],
            cfg["paddings"][i],
            activation="tanh" if last else None,
        )
        if not last:
            h = batchnorm_lrelu(h, params[f"bn{i}_g"], params[f"bn{i}_b"])

    return h                                                   # already NCHW


if __name__ == "__main__":
    # Small synthetic config consistent with the module's structure
    # (defaults use channels=(512,256,128,64,3), latent_dim=30 — shrunk here).
    cfg = dict(
        latent_dim=16,
        channels=(64, 32, 16, 8, 3),
        org_size=(4, 4),
        paddings=(1, 1, 1, 1),
        strides=(2, 2, 2, 2),
        kernel_sizes=(4, 4, 4, 6),
    )
    key = jax.random.PRNGKey(0)
    k_noise, k_params = jax.random.split(key)
    params = init_params(k_params, cfg)
    noise = jax.random.normal(k_noise, (2, cfg["latent_dim"]), jnp.float32)

    fwd = jax.jit(functools.partial(dcgan_generator_forward, cfg=cfg))
    out = fwd(noise, params)
    out = jax.block_until_ready(out)

    # 4 -> 8 -> 16 -> 32 -> 66 spatially; 3 output channels, NCHW.
    assert out.shape == (2, 3, 66, 66), out.shape
    assert out.dtype == jnp.float32
    assert bool(jnp.all(jnp.isfinite(out)))
    assert bool(jnp.all(jnp.abs(out) <= 1.0 + 1e-6))  # tanh range
    print("KERNEL_OK")
</pallas_src>

<mosaic_0001>
module attributes {stable_mosaic.version = 11 : i64} {
  func.func @_linear_lrelu_kernel(%arg0: i32, %arg1: memref<2x16xf32, #tpu.memory_space<vmem>>, %arg2: memref<16x1024xf32, #tpu.memory_space<vmem>>, %arg3: memref<1x1024xf32, #tpu.memory_space<vmem>>, %arg4: memref<2x1024xf32, #tpu.memory_space<vmem>>) attributes {dimension_semantics = [#tpu.dimension_semantics<arbitrary>], iteration_bounds = array<i64: 1>, scalar_prefetch = 0 : i64, scratch_operands = 0 : i64, tpu.core_type = #tpu.core_type<tc>, window_params = [{pipeline_mode = #tpu.pipeline_mode<synchronous>, transform_indices = @transform_0, window_bounds = array<i64: 2, 16>}, {pipeline_mode = #tpu.pipeline_mode<synchronous>, transform_indices = @transform_1, window_bounds = array<i64: 16, 1024>}, {pipeline_mode = #tpu.pipeline_mode<synchronous>, transform_indices = @transform_2, window_bounds = array<i64: 1, 1024>}, {pipeline_mode = #tpu.pipeline_mode<synchronous>, transform_indices = @transform_3, window_bounds = array<i64: 2, 1024>}]} {
    %c0 = arith.constant 0 : index
    %c0_0 = arith.constant 0 : index
    %0 = vector.load %arg1[%c0, %c0_0] : memref<2x16xf32, #tpu.memory_space<vmem>>, vector<2x16xf32>
    %c0_1 = arith.constant 0 : index
    %c0_2 = arith.constant 0 : index
    %1 = vector.load %arg2[%c0_1, %c0_2] : memref<16x1024xf32, #tpu.memory_space<vmem>>, vector<16x1024xf32>
    %cst = arith.constant dense<0.000000e+00> : vector<2x1024xf32>
    %2 = tpu.matmul %0, %1, %cst {dimension_numbers = #tpu.dot_dimension_numbers<[1], [0], [0], [1], [0, 0, 1, 1], [], []>} : vector<2x16xf32>, vector<16x1024xf32>, vector<2x1024xf32> -> vector<2x1024xf32>
    %c0_3 = arith.constant 0 : index
    %c0_4 = arith.constant 0 : index
    %3 = vector.load %arg3[%c0_3, %c0_4] : memref<1x1024xf32, #tpu.memory_space<vmem>>, vector<1x1024xf32>
    %4 = vector.broadcast %3 : vector<1x1024xf32> to vector<2x1024xf32>
    %5 = arith.addf %2, %4 : vector<2x1024xf32>
    %cst_5 = arith.constant 0.000000e+00 : f32
    %6 = vector.broadcast %cst_5 : f32 to vector<2x1024xf32>
    %7 = arith.cmpf oge, %5, %6 : vector<2x1024xf32>
    %cst_6 = arith.constant 2.000000e-01 : f32
    %8 = vector.broadcast %cst_6 : f32 to vector<2x1024xf32>
    %9 = arith.mulf %8, %5 : vector<2x1024xf32>
    %10 = arith.select %7, %5, %9 : vector<2x1024xi1>, vector<2x1024xf32>
    %c0_7 = arith.constant 0 : index
    %c0_8 = arith.constant 0 : index
    %11 = vector.load %arg4[%c0_7, %c0_8] : memref<2x1024xf32, #tpu.memory_space<vmem>>, vector<2x1024xf32>
    tpu.vector_store %arg4[%c0_7, %c0_8], %10 {strides = array<i32>} : memref<2x1024xf32, #tpu.memory_space<vmem>>, vector<2x1024xf32>,
    return
  }
  func.func @transform_0(%arg0: i32) -> (i32, i32) {
    %c0_i32 = arith.constant 0 : i32
    %c0_i32_0 = arith.constant 0 : i32
    %c0_i32_1 = arith.constant 0 : i32
    return %c0_i32, %c0_i32_0 : i32, i32
  }
  func.func @transform_1(%arg0: i32) -> (i32, i32) {
    %c0_i32 = arith.constant 0 : i32
    %c0_i32_0 = arith.constant 0 : i32
    %c0_i32_1 = arith.constant 0 : i32
    return %c0_i32, %c0_i32_0 : i32, i32
  }
  func.func @transform_2(%arg0: i32) -> (i32, i32) {
    %c0_i32 = arith.constant 0 : i32
    %c0_i32_0 = arith.constant 0 : i32
    %c0_i32_1 = arith.constant 0 : i32
    return %c0_i32, %c0_i32_0 : i32, i32
  }
  func.func @transform_3(%arg0: i32) -> (i32, i32) {
    %c0_i32 = arith.constant 0 : i32
    %c0_i32_0 = arith.constant 0 : i32
    %c0_i32_1 = arith.constant 0 : i32
    return %c0_i32, %c0_i32_0 : i32, i32
  }
}

module attributes {stable_mosaic.version = 11 : i64} {
  func.func @kernel(%arg0: i32, %arg1: i32, %arg2: memref<1x256x16xf32, #tpu.memory_space<vmem>>, %arg3: memref<32x256xf32, #tpu.memory_space<vmem>>, %arg4: memref<32x1xf32, #tpu.memory_space<vmem>>, %arg5: memref<1x32x16xf32, #tpu.memory_space<vmem>>) attributes {dimension_semantics = [#tpu.dimension_semantics<parallel>, #tpu.dimension_semantics<parallel>], iteration_bounds = array<i64: 2, 1>, scalar_prefetch = 0 : i64, scratch_operands = 0 : i64, tpu.core_type = #tpu.core_type<tc>, window_params = [{transform_indices = @transform_0, window_bounds = array<i64: 1, 256, 16>}, {pipeline_mode = #tpu.pipeline_mode<synchronous>, transform_indices = @transform_1, window_bounds = array<i64: 32, 256>}, {pipeline_mode = #tpu.pipeline_mode<synchronous>, transform_indices = @transform_2, window_bounds = array<i64: 32, 1>}, {transform_indices = @transform_3, window_bounds = array<i64: 1, 32, 16>}]} {
    %c0 = arith.constant 0 : index
    %c0_0 = arith.constant 0 : index
    %0 = vector.load %arg3[%c0, %c0_0] : memref<32x256xf32, #tpu.memory_space<vmem>>, vector<32x256xf32>
    %c0_1 = arith.constant 0 : index
    %c0_2 = arith.constant 0 : index
    %c0_3 = arith.constant 0 : index
    %1 = vector.load %arg2[%c0_1, %c0_2, %c0_3] : memref<1x256x16xf32, #tpu.memory_space<vmem>>, vector<1x256x16xf32>
    %2 = vector.shape_cast %1 : vector<1x256x16xf32> to vector<256x16xf32>
    %cst = arith.constant dense<0.000000e+00> : vector<32x16xf32>
    %3 = tpu.matmul %0, %2, %cst {dimension_numbers = #tpu.dot_dimension_numbers<[1], [0], [0], [1], [0, 0, 1, 1], [], []>} : vector<32x256xf32>, vector<256x16xf32>, vector<32x16xf32> -> vector<32x16xf32>
    %c0_4 = arith.constant 0 : index
    %c0_5 = arith.constant 0 : index
    %4 = vector.load %arg4[%c0_4, %c0_5] : memref<32x1xf32, #tpu.memory_space<vmem>>, vector<32x1xf32>
    %5 = vector.broadcast %4 : vector<32x1xf32> to vector<32x16xf32>
    %6 = arith.addf %3, %5 : vector<32x16xf32>
    %c0_6 = arith.constant 0 : index
    %c0_7 = arith.constant 0 : index
    %c0_8 = arith.constant 0 : index
    %7 = vector.load %arg5[%c0_6, %c0_7, %c0_8] : memref<1x32x16xf32, #tpu.memory_space<vmem>>, vector<1x32x16xf32>
    %8 = vector.shape_cast %7 : vector<1x32x16xf32> to vector<32x16xf32>
    %9 = vector.shape_cast %6 : vector<32x16xf32> to vector<1x32x16xf32>
    tpu.vector_store %arg5[%c0_6, %c0_7, %c0_8], %9 {strides = array<i32>} : memref<1x32x16xf32, #tpu.memory_space<vmem>>, vector<1x32x16xf32>,
    return
  }
  func.func @transform_0(%arg0: i32, %arg1: i32) -> (i32, i32, i32) {
    %c0_i32 = arith.constant 0 : i32
    %c0_i32_0 = arith.constant 0 : i32
    return %arg0, %c0_i32, %arg1 : i32, i32, i32
  }
  func.func @transform_1(%arg0: i32, %arg1: i32) -> (i32, i32) {
    %c0_i32 = arith.constant 0 : i32
    %c0_i32_0 = arith.constant 0 : i32
    %c0_i32_1 = arith.constant 0 : i32
    return %c0_i32, %c0_i32_0 : i32, i32
  }
  func.func @transform_2(%arg0: i32, %arg1: i32) -> (i32, i32) {
    %c0_i32 = arith.constant 0 : i32
    %c0_i32_0 = arith.constant 0 : i32
    %c0_i32_1 = arith.constant 0 : i32
    return %c0_i32, %c0_i32_0 : i32, i32
  }
  func.func @transform_3(%arg0: i32, %arg1: i32) -> (i32, i32, i32) {
    %c0_i32 = arith.constant 0 : i32
    %c0_i32_0 = arith.constant 0 : i32
    return %arg0, %c0_i32, %arg1 : i32, i32, i32
  }
}

module attributes {stable_mosaic.version = 11 : i64} {
  func.func @_bn_stats_kernel(%arg0: i32, %arg1: i32, %arg2: memref<1x32x64xf32, #tpu.memory_space<vmem>>, %arg3: memref<32x1xf32, #tpu.memory_space<vmem>>, %arg4: memref<32x1xf32, #tpu.memory_space<vmem>>) attributes {dimension_semantics = [#tpu.dimension_semantics<arbitrary>, #tpu.dimension_semantics<arbitrary>], iteration_bounds = array<i64: 2, 1>, scalar_prefetch = 0 : i64, scratch_operands = 0 : i64, tpu.core_type = #tpu.core_type<tc>, window_params = [{transform_indices = @transform_0, window_bounds = array<i64: 1, 32, 64>}, {pipeline_mode = #tpu.pipeline_mode<synchronous>, transform_indices = @transform_1, window_bounds = array<i64: 32, 1>}, {pipeline_mode = #tpu.pipeline_mode<synchronous>, transform_indices = @transform_2, window_bounds = array<i64: 32, 1>}]} {
    %c0_i32 = arith.constant 0 : i32
    %0 = arith.cmpi eq, %arg0, %c0_i32 : i32
    %c0_i32_0 = arith.constant 0 : i32
    %1 = arith.cmpi eq, %arg1, %c0_i32_0 : i32
    %2 = arith.andi %0, %1 : i1
    %3 = arith.extui %2 : i1 to i32
    %c0_i32_1 = arith.constant 0 : i32
    %4 = arith.cmpi ne, %3, %c0_i32_1 : i32
    scf.if %4 {
      %cst_13 = arith.constant 0.000000e+00 : f32
      %18 = vector.broadcast %cst_13 : f32 to vector<32x1xf32>
      %c0_14 = arith.constant 0 : index
      %c0_15 = arith.constant 0 : index
      %19 = vector.load %arg3[%c0_14, %c0_15] : memref<32x1xf32, #tpu.memory_space<vmem>>, vector<32x1xf32>
      tpu.vector_store %arg3[%c0_14, %c0_15], %18 {strides = array<i32>} : memref<32x1xf32, #tpu.memory_space<vmem>>, vector<32x1xf32>,
      %cst_16 = arith.constant 0.000000e+00 : f32
      %20 = vector.broadcast %cst_16 : f32 to vector<32x1xf32>
      %c0_17 = arith.constant 0 : index
      %c0_18 = arith.constant 0 : index
      %21 = vector.load %arg4[%c0_17, %c0_18] : memref<32x1xf32, #tpu.memory_space<vmem>>, vector<32x1xf32>
      tpu.vector_store %arg4[%c0_17, %c0_18], %20 {strides = array<i32>} : memref<32x1xf32, #tpu.memory_space<vmem>>, vector<32x1xf32>,
    } else {
    }
    %c0 = arith.constant 0 : index
    %c0_2 = arith.constant 0 : index
    %c0_3 = arith.constant 0 : index
    %5 = vector.load %arg2[%c0, %c0_2, %c0_3] : memref<1x32x64xf32, #tpu.memory_space<vmem>>, vector<1x32x64xf32>
    %6 = vector.shape_cast %5 : vector<1x32x64xf32> to vector<32x64xf32>
    %c0_4 = arith.constant 0 : index
    %c0_5 = arith.constant 0 : index
    %7 = vector.load %arg3[%c0_4, %c0_5] : memref<32x1xf32, #tpu.memory_space<vmem>>, vector<32x1xf32>
    %cst = arith.constant dense<0.000000e+00> : vector<32xf32>
    %8 = vector.multi_reduction <add>, %6, %cst [1] : vector<32x64xf32> to vector<32xf32>
    %9 = vector.shape_cast %8 : vector<32xf32> to vector<32x1xf32>
    %10 = arith.addf %7, %9 : vector<32x1xf32>
    %c0_6 = arith.constant 0 : index
    %c0_7 = arith.constant 0 : index
    %11 = vector.load %arg3[%c0_6, %c0_7] : memref<32x1xf32, #tpu.memory_space<vmem>>, vector<32x1xf32>
    tpu.vector_store %arg3[%c0_6, %c0_7], %10 {strides = array<i32>} : memref<32x1xf32, #tpu.memory_space<vmem>>, vector<32x1xf32>,
    %c0_8 = arith.constant 0 : index
    %c0_9 = arith.constant 0 : index
    %12 = vector.load %arg4[%c0_8, %c0_9] : memref<32x1xf32, #tpu.memory_space<vmem>>, vector<32x1xf32>
    %13 = arith.mulf %6, %6 : vector<32x64xf32>
    %cst_10 = arith.constant dense<0.000000e+00> : vector<32xf32>
    %14 = vector.multi_reduction <add>, %13, %cst_10 [1] : vector<32x64xf32> to vector<32xf32>
    %15 = vector.shape_cast %14 : vector<32xf32> to vector<32x1xf32>
    %16 = arith.addf %12, %15 : vector<32x1xf32>
    %c0_11 = arith.constant 0 : index
    %c0_12 = arith.constant 0 : index
    %17 = vector.load %arg4[%c0_11, %c0_12] : memref<32x1xf32, #tpu.memory_space<vmem>>, vector<32x1xf32>
    tpu.vector_store %arg4[%c0_11, %c0_12], %16 {strides = array<i32>} : memref<32x1xf32, #tpu.memory_space<vmem>>, vector<32x1xf32>,
    return
  }
  func.func @transform_0(%arg0: i32, %arg1: i32) -> (i32, i32, i32) {
    %c0_i32 = arith.constant 0 : i32
    %c0_i32_0 = arith.constant 0 : i32
    return %arg0, %c0_i32, %arg1 : i32, i32, i32
  }
  func.func @transform_1(%arg0: i32, %arg1: i32) -> (i32, i32) {
    %c0_i32 = arith.constant 0 : i32
    %c0_i32_0 = arith.constant 0 : i32
    %c0_i32_1 = arith.constant 0 : i32
    return %c0_i32, %c0_i32_0 : i32, i32
  }
  func.func @transform_2(%arg0: i32, %arg1: i32) -> (i32, i32) {
    %c0_i32 = arith.constant 0 : i32
    %c0_i32_0 = arith.constant 0 : i32
    %c0_i32_1 = arith.constant 0 : i32
    return %c0_i32, %c0_i32_0 : i32, i32
  }
}

module attributes {stable_mosaic.version = 11 : i64} {
  func.func @_bn_apply_kernel(%arg0: i32, %arg1: i32, %arg2: memref<1x32x64xf32, #tpu.memory_space<vmem>>, %arg3: memref<32x1xf32, #tpu.memory_space<vmem>>, %arg4: memref<32x1xf32, #tpu.memory_space<vmem>>, %arg5: memref<1x32x64xf32, #tpu.memory_space<vmem>>) attributes {dimension_semantics = [#tpu.dimension_semantics<parallel>, #tpu.dimension_semantics<parallel>], iteration_bounds = array<i64: 2, 1>, scalar_prefetch = 0 : i64, scratch_operands = 0 : i64, tpu.core_type = #tpu.core_type<tc>, window_params = [{transform_indices = @transform_0, window_bounds = array<i64: 1, 32, 64>}, {pipeline_mode = #tpu.pipeline_mode<synchronous>, transform_indices = @transform_1, window_bounds = array<i64: 32, 1>}, {pipeline_mode = #tpu.pipeline_mode<synchronous>, transform_indices = @transform_2, window_bounds = array<i64: 32, 1>}, {transform_indices = @transform_3, window_bounds = array<i64: 1, 32, 64>}]} {
    %c0 = arith.constant 0 : index
    %c0_0 = arith.constant 0 : index
    %c0_1 = arith.constant 0 : index
    %0 = vector.load %arg2[%c0, %c0_0, %c0_1] : memref<1x32x64xf32, #tpu.memory_space<vmem>>, vector<1x32x64xf32>
    %1 = vector.shape_cast %0 : vector<1x32x64xf32> to vector<32x64xf32>
    %c0_2 = arith.constant 0 : index
    %c0_3 = arith.constant 0 : index
    %2 = vector.load %arg3[%c0_2, %c0_3] : memref<32x1xf32, #tpu.memory_space<vmem>>, vector<32x1xf32>
    %3 = vector.broadcast %2 : vector<32x1xf32> to vector<32x64xf32>
    %4 = arith.mulf %1, %3 : vector<32x64xf32>
    %c0_4 = arith.constant 0 : index
    %c0_5 = arith.constant 0 : index
    %5 = vector.load %arg4[%c0_4, %c0_5] : memref<32x1xf32, #tpu.memory_space<vmem>>, vector<32x1xf32>
    %6 = vector.broadcast %5 : vector<32x1xf32> to vector<32x64xf32>
    %7 = arith.addf %4, %6 : vector<32x64xf32>
    %cst = arith.constant 0.000000e+00 : f32
    %8 = vector.broadcast %cst : f32 to vector<32x64xf32>
    %9 = arith.cmpf oge, %7, %8 : vector<32x64xf32>
    %cst_6 = arith.constant 2.000000e-01 : f32
    %10 = vector.broadcast %cst_6 : f32 to vector<32x64xf32>
    %11 = arith.mulf %10, %7 : vector<32x64xf32>
    %12 = arith.select %9, %7, %11 : vector<32x64xi1>, vector<32x64xf32>
    %c0_7 = arith.constant 0 : index
    %c0_8 = arith.constant 0 : index
    %c0_9 = arith.constant 0 : index
    %13 = vector.load %arg5[%c0_7, %c0_8, %c0_9] : memref<1x32x64xf32, #tpu.memory_space<vmem>>, vector<1x32x64xf32>
    %14 = vector.shape_cast %13 : vector<1x32x64xf32> to vector<32x64xf32>
    %15 = vector.shape_cast %12 : vector<32x64xf32> to vector<1x32x64xf32>
    tpu.vector_store %arg5[%c0_7, %c0_8, %c0_9], %15 {strides = array<i32>} : memref<1x32x64xf32, #tpu.memory_space<vmem>>, vector<1x32x64xf32>,
    return
  }
  func.func @transform_0(%arg0: i32, %arg1: i32) -> (i32, i32, i32) {
    %c0_i32 = arith.constant 0 : i32
    %c0_i32_0 = arith.constant 0 : i32
    return %arg0, %c0_i32, %arg1 : i32, i32, i32
  }
  func.func @transform_1(%arg0: i32, %arg1: i32) -> (i32, i32) {
    %c0_i32 = arith.constant 0 : i32
    %c0_i32_0 = arith.constant 0 : i32
    %c0_i32_1 = arith.constant 0 : i32
    return %c0_i32, %c0_i32_0 : i32, i32
  }
  func.func @transform_2(%arg0: i32, %arg1: i32) -> (i32, i32) {
    %c0_i32 = arith.constant 0 : i32
    %c0_i32_0 = arith.constant 0 : i32
    %c0_i32_1 = arith.constant 0 : i32
    return %c0_i32, %c0_i32_0 : i32, i32
  }
  func.func @transform_3(%arg0: i32, %arg1: i32) -> (i32, i32, i32) {
    %c0_i32 = arith.constant 0 : i32
    %c0_i32_0 = arith.constant 0 : i32
    return %arg0, %c0_i32, %arg1 : i32, i32, i32
  }
}

module attributes {stable_mosaic.version = 11 : i64} {
  func.func @kernel(%arg0: i32, %arg1: i32, %arg2: memref<1x128x64xf32, #tpu.memory_space<vmem>>, %arg3: memref<16x128xf32, #tpu.memory_space<vmem>>, %arg4: memref<16x1xf32, #tpu.memory_space<vmem>>, %arg5: memref<1x16x64xf32, #tpu.memory_space<vmem>>) attributes {dimension_semantics = [#tpu.dimension_semantics<parallel>, #tpu.dimension_semantics<parallel>], iteration_bounds = array<i64: 2, 1>, scalar_prefetch = 0 : i64, scratch_operands = 0 : i64, tpu.core_type = #tpu.core_type<tc>, window_params = [{transform_indices = @transform_0, window_bounds = array<i64: 1, 128, 64>}, {pipeline_mode = #tpu.pipeline_mode<synchronous>, transform_indices = @transform_1, window_bounds = array<i64: 16, 128>}, {pipeline_mode = #tpu.pipeline_mode<synchronous>, transform_indices = @transform_2, window_bounds = array<i64: 16, 1>}, {transform_indices = @transform_3, window_bounds = array<i64: 1, 16, 64>}]} {
    %c0 = arith.constant 0 : index
    %c0_0 = arith.constant 0 : index
    %0 = vector.load %arg3[%c0, %c0_0] : memref<16x128xf32, #tpu.memory_space<vmem>>, vector<16x128xf32>
    %c0_1 = arith.constant 0 : index
    %c0_2 = arith.constant 0 : index
    %c0_3 = arith.constant 0 : index
    %1 = vector.load %arg2[%c0_1, %c0_2, %c0_3] : memref<1x128x64xf32, #tpu.memory_space<vmem>>, vector<1x128x64xf32>
    %2 = vector.shape_cast %1 : vector<1x128x64xf32> to vector<128x64xf32>
    %cst = arith.constant dense<0.000000e+00> : vector<16x64xf32>
    %3 = tpu.matmul %0, %2, %cst {dimension_numbers = #tpu.dot_dimension_numbers<[1], [0], [0], [1], [0, 0, 1, 1], [], []>} : vector<16x128xf32>, vector<128x64xf32>, vector<16x64xf32> -> vector<16x64xf32>
    %c0_4 = arith.constant 0 : index
    %c0_5 = arith.constant 0 : index
    %4 = vector.load %arg4[%c0_4, %c0_5] : memref<16x1xf32, #tpu.memory_space<vmem>>, vector<16x1xf32>
    %5 = vector.broadcast %4 : vector<16x1xf32> to vector<16x64xf32>
    %6 = arith.addf %3, %5 : vector<16x64xf32>
    %c0_6 = arith.constant 0 : index
    %c0_7 = arith.constant 0 : index
    %c0_8 = arith.constant 0 : index
    %7 = vector.load %arg5[%c0_6, %c0_7, %c0_8] : memref<1x16x64xf32, #tpu.memory_space<vmem>>, vector<1x16x64xf32>
    %8 = vector.shape_cast %7 : vector<1x16x64xf32> to vector<16x64xf32>
    %9 = vector.shape_cast %6 : vector<16x64xf32> to vector<1x16x64xf32>
    tpu.vector_store %arg5[%c0_6, %c0_7, %c0_8], %9 {strides = array<i32>} : memref<1x16x64xf32, #tpu.memory_space<vmem>>, vector<1x16x64xf32>,
    return
  }
  func.func @transform_0(%arg0: i32, %arg1: i32) -> (i32, i32, i32) {
    %c0_i32 = arith.constant 0 : i32
    %c0_i32_0 = arith.constant 0 : i32
    return %arg0, %c0_i32, %arg1 : i32, i32, i32
  }
  func.func @transform_1(%arg0: i32, %arg1: i32) -> (i32, i32) {
    %c0_i32 = arith.constant 0 : i32
    %c0_i32_0 = arith.constant 0 : i32
    %c0_i32_1 = arith.constant 0 : i32
    return %c0_i32, %c0_i32_0 : i32, i32
  }
  func.func @transform_2(%arg0: i32, %arg1: i32) -> (i32, i32) {
    %c0_i32 = arith.constant 0 : i32
    %c0_i32_0 = arith.constant 0 : i32
    %c0_i32_1 = arith.constant 0 : i32
    return %c0_i32, %c0_i32_0 : i32, i32
  }
  func.func @transform_3(%arg0: i32, %arg1: i32) -> (i32, i32, i32) {
    %c0_i32 = arith.constant 0 : i32
    %c0_i32_0 = arith.constant 0 : i32
    return %arg0, %c0_i32, %arg1 : i32, i32, i32
  }
}

module attributes {stable_mosaic.version = 11 : i64} {
  func.func @_bn_stats_kernel(%arg0: i32, %arg1: i32, %arg2: memref<1x16x256xf32, #tpu.memory_space<vmem>>, %arg3: memref<16x1xf32, #tpu.memory_space<vmem>>, %arg4: memref<16x1xf32, #tpu.memory_space<vmem>>) attributes {dimension_semantics = [#tpu.dimension_semantics<arbitrary>, #tpu.dimension_semantics<arbitrary>], iteration_bounds = array<i64: 2, 1>, scalar_prefetch = 0 : i64, scratch_operands = 0 : i64, tpu.core_type = #tpu.core_type<tc>, window_params = [{transform_indices = @transform_0, window_bounds = array<i64: 1, 16, 256>}, {pipeline_mode = #tpu.pipeline_mode<synchronous>, transform_indices = @transform_1, window_bounds = array<i64: 16, 1>}, {pipeline_mode = #tpu.pipeline_mode<synchronous>, transform_indices = @transform_2, window_bounds = array<i64: 16, 1>}]} {
    %c0_i32 = arith.constant 0 : i32
    %0 = arith.cmpi eq, %arg0, %c0_i32 : i32
    %c0_i32_0 = arith.constant 0 : i32
    %1 = arith.cmpi eq, %arg1, %c0_i32_0 : i32
    %2 = arith.andi %0, %1 : i1
    %3 = arith.extui %2 : i1 to i32
    %c0_i32_1 = arith.constant 0 : i32
    %4 = arith.cmpi ne, %3, %c0_i32_1 : i32
    scf.if %4 {
      %cst_13 = arith.constant 0.000000e+00 : f32
      %18 = vector.broadcast %cst_13 : f32 to vector<16x1xf32>
      %c0_14 = arith.constant 0 : index
      %c0_15 = arith.constant 0 : index
      %19 = vector.load %arg3[%c0_14, %c0_15] : memref<16x1xf32, #tpu.memory_space<vmem>>, vector<16x1xf32>
      tpu.vector_store %arg3[%c0_14, %c0_15], %18 {strides = array<i32>} : memref<16x1xf32, #tpu.memory_space<vmem>>, vector<16x1xf32>,
      %cst_16 = arith.constant 0.000000e+00 : f32
      %20 = vector.broadcast %cst_16 : f32 to vector<16x1xf32>
      %c0_17 = arith.constant 0 : index
      %c0_18 = arith.constant 0 : index
      %21 = vector.load %arg4[%c0_17, %c0_18] : memref<16x1xf32, #tpu.memory_space<vmem>>, vector<16x1xf32>
      tpu.vector_store %arg4[%c0_17, %c0_18], %20 {strides = array<i32>} : memref<16x1xf32, #tpu.memory_space<vmem>>, vector<16x1xf32>,
    } else {
    }
    %c0 = arith.constant 0 : index
    %c0_2 = arith.constant 0 : index
    %c0_3 = arith.constant 0 : index
    %5 = vector.load %arg2[%c0, %c0_2, %c0_3] : memref<1x16x256xf32, #tpu.memory_space<vmem>>, vector<1x16x256xf32>
    %6 = vector.shape_cast %5 : vector<1x16x256xf32> to vector<16x256xf32>
    %c0_4 = arith.constant 0 : index
    %c0_5 = arith.constant 0 : index
    %7 = vector.load %arg3[%c0_4, %c0_5] : memref<16x1xf32, #tpu.memory_space<vmem>>, vector<16x1xf32>
    %cst = arith.constant dense<0.000000e+00> : vector<16xf32>
    %8 = vector.multi_reduction <add>, %6, %cst [1] : vector<16x256xf32> to vector<16xf32>
    %9 = vector.shape_cast %8 : vector<16xf32> to vector<16x1xf32>
    %10 = arith.addf %7, %9 : vector<16x1xf32>
    %c0_6 = arith.constant 0 : index
    %c0_7 = arith.constant 0 : index
    %11 = vector.load %arg3[%c0_6, %c0_7] : memref<16x1xf32, #tpu.memory_space<vmem>>, vector<16x1xf32>
    tpu.vector_store %arg3[%c0_6, %c0_7], %10 {strides = array<i32>} : memref<16x1xf32, #tpu.memory_space<vmem>>, vector<16x1xf32>,
    %c0_8 = arith.constant 0 : index
    %c0_9 = arith.constant 0 : index
    %12 = vector.load %arg4[%c0_8, %c0_9] : memref<16x1xf32, #tpu.memory_space<vmem>>, vector<16x1xf32>
    %13 = arith.mulf %6, %6 : vector<16x256xf32>
    %cst_10 = arith.constant dense<0.000000e+00> : vector<16xf32>
    %14 = vector.multi_reduction <add>, %13, %cst_10 [1] : vector<16x256xf32> to vector<16xf32>
    %15 = vector.shape_cast %14 : vector<16xf32> to vector<16x1xf32>
    %16 = arith.addf %12, %15 : vector<16x1xf32>
    %c0_11 = arith.constant 0 : index
    %c0_12 = arith.constant 0 : index
    %17 = vector.load %arg4[%c0_11, %c0_12] : memref<16x1xf32, #tpu.memory_space<vmem>>, vector<16x1xf32>
    tpu.vector_store %arg4[%c0_11, %c0_12], %16 {strides = array<i32>} : memref<16x1xf32, #tpu.memory_space<vmem>>, vector<16x1xf32>,
    return
  }
  func.func @transform_0(%arg0: i32, %arg1: i32) -> (i32, i32, i32) {
    %c0_i32 = arith.constant 0 : i32
    %c0_i32_0 = arith.constant 0 : i32
    return %arg0, %c0_i32, %arg1 : i32, i32, i32
  }
  func.func @transform_1(%arg0: i32, %arg1: i32) -> (i32, i32) {
    %c0_i32 = arith.constant 0 : i32
    %c0_i32_0 = arith.constant 0 : i32
    %c0_i32_1 = arith.constant 0 : i32
    return %c0_i32, %c0_i32_0 : i32, i32
  }
  func.func @transform_2(%arg0: i32, %arg1: i32) -> (i32, i32) {
    %c0_i32 = arith.constant 0 : i32
    %c0_i32_0 = arith.constant 0 : i32
    %c0_i32_1 = arith.constant 0 : i32
    return %c0_i32, %c0_i32_0 : i32, i32
  }
}

module attributes {stable_mosaic.version = 11 : i64} {
  func.func @_bn_apply_kernel(%arg0: i32, %arg1: i32, %arg2: memref<1x16x256xf32, #tpu.memory_space<vmem>>, %arg3: memref<16x1xf32, #tpu.memory_space<vmem>>, %arg4: memref<16x1xf32, #tpu.memory_space<vmem>>, %arg5: memref<1x16x256xf32, #tpu.memory_space<vmem>>) attributes {dimension_semantics = [#tpu.dimension_semantics<parallel>, #tpu.dimension_semantics<parallel>], iteration_bounds = array<i64: 2, 1>, scalar_prefetch = 0 : i64, scratch_operands = 0 : i64, tpu.core_type = #tpu.core_type<tc>, window_params = [{transform_indices = @transform_0, window_bounds = array<i64: 1, 16, 256>}, {pipeline_mode = #tpu.pipeline_mode<synchronous>, transform_indices = @transform_1, window_bounds = array<i64: 16, 1>}, {pipeline_mode = #tpu.pipeline_mode<synchronous>, transform_indices = @transform_2, window_bounds = array<i64: 16, 1>}, {transform_indices = @transform_3, window_bounds = array<i64: 1, 16, 256>}]} {
    %c0 = arith.constant 0 : index
    %c0_0 = arith.constant 0 : index
    %c0_1 = arith.constant 0 : index
    %0 = vector.load %arg2[%c0, %c0_0, %c0_1] : memref<1x16x256xf32, #tpu.memory_space<vmem>>, vector<1x16x256xf32>
    %1 = vector.shape_cast %0 : vector<1x16x256xf32> to vector<16x256xf32>
    %c0_2 = arith.constant 0 : index
    %c0_3 = arith.constant 0 : index
    %2 = vector.load %arg3[%c0_2, %c0_3] : memref<16x1xf32, #tpu.memory_space<vmem>>, vector<16x1xf32>
    %3 = vector.broadcast %2 : vector<16x1xf32> to vector<16x256xf32>
    %4 = arith.mulf %1, %3 : vector<16x256xf32>
    %c0_4 = arith.constant 0 : index
    %c0_5 = arith.constant 0 : index
    %5 = vector.load %arg4[%c0_4, %c0_5] : memref<16x1xf32, #tpu.memory_space<vmem>>, vector<16x1xf32>
    %6 = vector.broadcast %5 : vector<16x1xf32> to vector<16x256xf32>
    %7 = arith.addf %4, %6 : vector<16x256xf32>
    %cst = arith.constant 0.000000e+00 : f32
    %8 = vector.broadcast %cst : f32 to vector<16x256xf32>
    %9 = arith.cmpf oge, %7, %8 : vector<16x256xf32>
    %cst_6 = arith.constant 2.000000e-01 : f32
    %10 = vector.broadcast %cst_6 : f32 to vector<16x256xf32>
    %11 = arith.mulf %10, %7 : vector<16x256xf32>
    %12 = arith.select %9, %7, %11 : vector<16x256xi1>, vector<16x256xf32>
    %c0_7 = arith.constant 0 : index
    %c0_8 = arith.constant 0 : index
    %c0_9 = arith.constant 0 : index
    %13 = vector.load %arg5[%c0_7, %c0_8, %c0_9] : memref<1x16x256xf32, #tpu.memory_space<vmem>>, vector<1x16x256xf32>
    %14 = vector.shape_cast %13 : vector<1x16x256xf32> to vector<16x256xf32>
    %15 = vector.shape_cast %12 : vector<16x256xf32> to vector<1x16x256xf32>
    tpu.vector_store %arg5[%c0_7, %c0_8, %c0_9], %15 {strides = array<i32>} : memref<1x16x256xf32, #tpu.memory_space<vmem>>, vector<1x16x256xf32>,
    return
  }
  func.func @transform_0(%arg0: i32, %arg1: i32) -> (i32, i32, i32) {
    %c0_i32 = arith.constant 0 : i32
    %c0_i32_0 = arith.constant 0 : i32
    return %arg0, %c0_i32, %arg1 : i32, i32, i32
  }
  func.func @transform_1(%arg0: i32, %arg1: i32) -> (i32, i32) {
    %c0_i32 = arith.constant 0 : i32
    %c0_i32_0 = arith.constant 0 : i32
    %c0_i32_1 = arith.constant 0 : i32
    return %c0_i32, %c0_i32_0 : i32, i32
  }
  func.func @transform_2(%arg0: i32, %arg1: i32) -> (i32, i32) {
    %c0_i32 = arith.constant 0 : i32
    %c0_i32_0 = arith.constant 0 : i32
    %c0_i32_1 = arith.constant 0 : i32
    return %c0_i32, %c0_i32_0 : i32, i32
  }
  func.func @transform_3(%arg0: i32, %arg1: i32) -> (i32, i32, i32) {
    %c0_i32 = arith.constant 0 : i32
    %c0_i32_0 = arith.constant 0 : i32
    return %arg0, %c0_i32, %arg1 : i32, i32, i32
  }
}

module attributes {stable_mosaic.version = 11 : i64} {
  func.func @kernel(%arg0: i32, %arg1: i32, %arg2: memref<1x64x256xf32, #tpu.memory_space<vmem>>, %arg3: memref<8x64xf32, #tpu.memory_space<vmem>>, %arg4: memref<8x1xf32, #tpu.memory_space<vmem>>, %arg5: memref<1x8x256xf32, #tpu.memory_space<vmem>>) attributes {dimension_semantics = [#tpu.dimension_semantics<parallel>, #tpu.dimension_semantics<parallel>], iteration_bounds = array<i64: 2, 1>, scalar_prefetch = 0 : i64, scratch_operands = 0 : i64, tpu.core_type = #tpu.core_type<tc>, window_params = [{transform_indices = @transform_0, window_bounds = array<i64: 1, 64, 256>}, {pipeline_mode = #tpu.pipeline_mode<synchronous>, transform_indices = @transform_1, window_bounds = array<i64: 8, 64>}, {pipeline_mode = #tpu.pipeline_mode<synchronous>, transform_indices = @transform_2, window_bounds = array<i64: 8, 1>}, {transform_indices = @transform_3, window_bounds = array<i64: 1, 8, 256>}]} {
    %c0 = arith.constant 0 : index
    %c0_0 = arith.constant 0 : index
    %0 = vector.load %arg3[%c0, %c0_0] : memref<8x64xf32, #tpu.memory_space<vmem>>, vector<8x64xf32>
    %c0_1 = arith.constant 0 : index
    %c0_2 = arith.constant 0 : index
    %c0_3 = arith.constant 0 : index
    %1 = vector.load %arg2[%c0_1, %c0_2, %c0_3] : memref<1x64x256xf32, #tpu.memory_space<vmem>>, vector<1x64x256xf32>
    %2 = vector.shape_cast %1 : vector<1x64x256xf32> to vector<64x256xf32>
    %cst = arith.constant dense<0.000000e+00> : vector<8x256xf32>
    %3 = tpu.matmul %0, %2, %cst {dimension_numbers = #tpu.dot_dimension_numbers<[1], [0], [0], [1], [0, 0, 1, 1], [], []>} : vector<8x64xf32>, vector<64x256xf32>, vector<8x256xf32> -> vector<8x256xf32>
    %c0_4 = arith.constant 0 : index
    %c0_5 = arith.constant 0 : index
    %4 = vector.load %arg4[%c0_4, %c0_5] : memref<8x1xf32, #tpu.memory_space<vmem>>, vector<8x1xf32>
    %5 = vector.broadcast %4 : vector<8x1xf32> to vector<8x256xf32>
    %6 = arith.addf %3, %5 : vector<8x256xf32>
    %c0_6 = arith.constant 0 : index
    %c0_7 = arith.constant 0 : index
    %c0_8 = arith.constant 0 : index
    %7 = vector.load %arg5[%c0_6, %c0_7, %c0_8] : memref<1x8x256xf32, #tpu.memory_space<vmem>>, vector<1x8x256xf32>
    %8 = vector.shape_cast %7 : vector<1x8x256xf32> to vector<8x256xf32>
    %9 = vector.shape_cast %6 : vector<8x256xf32> to vector<1x8x256xf32>
    tpu.vector_store %arg5[%c0_6, %c0_7, %c0_8], %9 {strides = array<i32>} : memref<1x8x256xf32, #tpu.memory_space<vmem>>, vector<1x8x256xf32>,
    return
  }
  func.func @transform_0(%arg0: i32, %arg1: i32) -> (i32, i32, i32) {
    %c0_i32 = arith.constant 0 : i32
    %c0_i32_0 = arith.constant 0 : i32
    return %arg0, %c0_i32, %arg1 : i32, i32, i32
  }
  func.func @transform_1(%arg0: i32, %arg1: i32) -> (i32, i32) {
    %c0_i32 = arith.constant 0 : i32
    %c0_i32_0 = arith.constant 0 : i32
    %c0_i32_1 = arith.constant 0 : i32
    return %c0_i32, %c0_i32_0 : i32, i32
  }
  func.func @transform_2(%arg0: i32, %arg1: i32) -> (i32, i32) {
    %c0_i32 = arith.constant 0 : i32
    %c0_i32_0 = arith.constant 0 : i32
    %c0_i32_1 = arith.constant 0 : i32
    return %c0_i32, %c0_i32_0 : i32, i32
  }
  func.func @transform_3(%arg0: i32, %arg1: i32) -> (i32, i32, i32) {
    %c0_i32 = arith.constant 0 : i32
    %c0_i32_0 = arith.constant 0 : i32
    return %arg0, %c0_i32, %arg1 : i32, i32, i32
  }
}

module attributes {stable_mosaic.version = 11 : i64} {
  func.func @_bn_stats_kernel(%arg0: i32, %arg1: i32, %arg2: memref<1x8x1024xf32, #tpu.memory_space<vmem>>, %arg3: memref<8x1xf32, #tpu.memory_space<vmem>>, %arg4: memref<8x1xf32, #tpu.memory_space<vmem>>) attributes {dimension_semantics = [#tpu.dimension_semantics<arbitrary>, #tpu.dimension_semantics<arbitrary>], iteration_bounds = array<i64: 2, 1>, scalar_prefetch = 0 : i64, scratch_operands = 0 : i64, tpu.core_type = #tpu.core_type<tc>, window_params = [{transform_indices = @transform_0, window_bounds = array<i64: 1, 8, 1024>}, {pipeline_mode = #tpu.pipeline_mode<synchronous>, transform_indices = @transform_1, window_bounds = array<i64: 8, 1>}, {pipeline_mode = #tpu.pipeline_mode<synchronous>, transform_indices = @transform_2, window_bounds = array<i64: 8, 1>}]} {
    %c0_i32 = arith.constant 0 : i32
    %0 = arith.cmpi eq, %arg0, %c0_i32 : i32
    %c0_i32_0 = arith.constant 0 : i32
    %1 = arith.cmpi eq, %arg1, %c0_i32_0 : i32
    %2 = arith.andi %0, %1 : i1
    %3 = arith.extui %2 : i1 to i32
    %c0_i32_1 = arith.constant 0 : i32
    %4 = arith.cmpi ne, %3, %c0_i32_1 : i32
    scf.if %4 {
      %cst_13 = arith.constant 0.000000e+00 : f32
      %18 = vector.broadcast %cst_13 : f32 to vector<8x1xf32>
      %c0_14 = arith.constant 0 : index
      %c0_15 = arith.constant 0 : index
      %19 = vector.load %arg3[%c0_14, %c0_15] : memref<8x1xf32, #tpu.memory_space<vmem>>, vector<8x1xf32>
      tpu.vector_store %arg3[%c0_14, %c0_15], %18 {strides = array<i32>} : memref<8x1xf32, #tpu.memory_space<vmem>>, vector<8x1xf32>,
      %cst_16 = arith.constant 0.000000e+00 : f32
      %20 = vector.broadcast %cst_16 : f32 to vector<8x1xf32>
      %c0_17 = arith.constant 0 : index
      %c0_18 = arith.constant 0 : index
      %21 = vector.load %arg4[%c0_17, %c0_18] : memref<8x1xf32, #tpu.memory_space<vmem>>, vector<8x1xf32>
      tpu.vector_store %arg4[%c0_17, %c0_18], %20 {strides = array<i32>} : memref<8x1xf32, #tpu.memory_space<vmem>>, vector<8x1xf32>,
    } else {
    }
    %c0 = arith.constant 0 : index
    %c0_2 = arith.constant 0 : index
    %c0_3 = arith.constant 0 : index
    %5 = vector.load %arg2[%c0, %c0_2, %c0_3] : memref<1x8x1024xf32, #tpu.memory_space<vmem>>, vector<1x8x1024xf32>
    %6 = vector.shape_cast %5 : vector<1x8x1024xf32> to vector<8x1024xf32>
    %c0_4 = arith.constant 0 : index
    %c0_5 = arith.constant 0 : index
    %7 = vector.load %arg3[%c0_4, %c0_5] : memref<8x1xf32, #tpu.memory_space<vmem>>, vector<8x1xf32>
    %cst = arith.constant dense<0.000000e+00> : vector<8xf32>
    %8 = vector.multi_reduction <add>, %6, %cst [1] : vector<8x1024xf32> to vector<8xf32>
    %9 = vector.shape_cast %8 : vector<8xf32> to vector<8x1xf32>
    %10 = arith.addf %7, %9 : vector<8x1xf32>
    %c0_6 = arith.constant 0 : index
    %c0_7 = arith.constant 0 : index
    %11 = vector.load %arg3[%c0_6, %c0_7] : memref<8x1xf32, #tpu.memory_space<vmem>>, vector<8x1xf32>
    tpu.vector_store %arg3[%c0_6, %c0_7], %10 {strides = array<i32>} : memref<8x1xf32, #tpu.memory_space<vmem>>, vector<8x1xf32>,
    %c0_8 = arith.constant 0 : index
    %c0_9 = arith.constant 0 : index
    %12 = vector.load %arg4[%c0_8, %c0_9] : memref<8x1xf32, #tpu.memory_space<vmem>>, vector<8x1xf32>
    %13 = arith.mulf %6, %6 : vector<8x1024xf32>
    %cst_10 = arith.constant dense<0.000000e+00> : vector<8xf32>
    %14 = vector.multi_reduction <add>, %13, %cst_10 [1] : vector<8x1024xf32> to vector<8xf32>
    %15 = vector.shape_cast %14 : vector<8xf32> to vector<8x1xf32>
    %16 = arith.addf %12, %15 : vector<8x1xf32>
    %c0_11 = arith.constant 0 : index
    %c0_12 = arith.constant 0 : index
    %17 = vector.load %arg4[%c0_11, %c0_12] : memref<8x1xf32, #tpu.memory_space<vmem>>, vector<8x1xf32>
    tpu.vector_store %arg4[%c0_11, %c0_12], %16 {strides = array<i32>} : memref<8x1xf32, #tpu.memory_space<vmem>>, vector<8x1xf32>,
    return
  }
  func.func @transform_0(%arg0: i32, %arg1: i32) -> (i32, i32, i32) {
    %c0_i32 = arith.constant 0 : i32
    %c0_i32_0 = arith.constant 0 : i32
    return %arg0, %c0_i32, %arg1 : i32, i32, i32
  }
  func.func @transform_1(%arg0: i32, %arg1: i32) -> (i32, i32) {
    %c0_i32 = arith.constant 0 : i32
    %c0_i32_0 = arith.constant 0 : i32
    %c0_i32_1 = arith.constant 0 : i32
    return %c0_i32, %c0_i32_0 : i32, i32
  }
  func.func @transform_2(%arg0: i32, %arg1: i32) -> (i32, i32) {
    %c0_i32 = arith.constant 0 : i32
    %c0_i32_0 = arith.constant 0 : i32
    %c0_i32_1 = arith.constant 0 : i32
    return %c0_i32, %c0_i32_0 : i32, i32
  }
}

module attributes {stable_mosaic.version = 11 : i64} {
  func.func @_bn_apply_kernel(%arg0: i32, %arg1: i32, %arg2: memref<1x8x1024xf32, #tpu.memory_space<vmem>>, %arg3: memref<8x1xf32, #tpu.memory_space<vmem>>, %arg4: memref<8x1xf32, #tpu.memory_space<vmem>>, %arg5: memref<1x8x1024xf32, #tpu.memory_space<vmem>>) attributes {dimension_semantics = [#tpu.dimension_semantics<parallel>, #tpu.dimension_semantics<parallel>], iteration_bounds = array<i64: 2, 1>, scalar_prefetch = 0 : i64, scratch_operands = 0 : i64, tpu.core_type = #tpu.core_type<tc>, window_params = [{transform_indices = @transform_0, window_bounds = array<i64: 1, 8, 1024>}, {pipeline_mode = #tpu.pipeline_mode<synchronous>, transform_indices = @transform_1, window_bounds = array<i64: 8, 1>}, {pipeline_mode = #tpu.pipeline_mode<synchronous>, transform_indices = @transform_2, window_bounds = array<i64: 8, 1>}, {transform_indices = @transform_3, window_bounds = array<i64: 1, 8, 1024>}]} {
    %c0 = arith.constant 0 : index
    %c0_0 = arith.constant 0 : index
    %c0_1 = arith.constant 0 : index
    %0 = vector.load %arg2[%c0, %c0_0, %c0_1] : memref<1x8x1024xf32, #tpu.memory_space<vmem>>, vector<1x8x1024xf32>
    %1 = vector.shape_cast %0 : vector<1x8x1024xf32> to vector<8x1024xf32>
    %c0_2 = arith.constant 0 : index
    %c0_3 = arith.constant 0 : index
    %2 = vector.load %arg3[%c0_2, %c0_3] : memref<8x1xf32, #tpu.memory_space<vmem>>, vector<8x1xf32>
    %3 = vector.broadcast %2 : vector<8x1xf32> to vector<8x1024xf32>
    %4 = arith.mulf %1, %3 : vector<8x1024xf32>
    %c0_4 = arith.constant 0 : index
    %c0_5 = arith.constant 0 : index
    %5 = vector.load %arg4[%c0_4, %c0_5] : memref<8x1xf32, #tpu.memory_space<vmem>>, vector<8x1xf32>
    %6 = vector.broadcast %5 : vector<8x1xf32> to vector<8x1024xf32>
    %7 = arith.addf %4, %6 : vector<8x1024xf32>
    %cst = arith.constant 0.000000e+00 : f32
    %8 = vector.broadcast %cst : f32 to vector<8x1024xf32>
    %9 = arith.cmpf oge, %7, %8 : vector<8x1024xf32>
    %cst_6 = arith.constant 2.000000e-01 : f32
    %10 = vector.broadcast %cst_6 : f32 to vector<8x1024xf32>
    %11 = arith.mulf %10, %7 : vector<8x1024xf32>
    %12 = arith.select %9, %7, %11 : vector<8x1024xi1>, vector<8x1024xf32>
    %c0_7 = arith.constant 0 : index
    %c0_8 = arith.constant 0 : index
    %c0_9 = arith.constant 0 : index
    %13 = vector.load %arg5[%c0_7, %c0_8, %c0_9] : memref<1x8x1024xf32, #tpu.memory_space<vmem>>, vector<1x8x1024xf32>
    %14 = vector.shape_cast %13 : vector<1x8x1024xf32> to vector<8x1024xf32>
    %15 = vector.shape_cast %12 : vector<8x1024xf32> to vector<1x8x1024xf32>
    tpu.vector_store %arg5[%c0_7, %c0_8, %c0_9], %15 {strides = array<i32>} : memref<1x8x1024xf32, #tpu.memory_space<vmem>>, vector<1x8x1024xf32>,
    return
  }
  func.func @transform_0(%arg0: i32, %arg1: i32) -> (i32, i32, i32) {
    %c0_i32 = arith.constant 0 : i32
    %c0_i32_0 = arith.constant 0 : i32
    return %arg0, %c0_i32, %arg1 : i32, i32, i32
  }
  func.func @transform_1(%arg0: i32, %arg1: i32) -> (i32, i32) {
    %c0_i32 = arith.constant 0 : i32
    %c0_i32_0 = arith.constant 0 : i32
    %c0_i32_1 = arith.constant 0 : i32
    return %c0_i32, %c0_i32_0 : i32, i32
  }
  func.func @transform_2(%arg0: i32, %arg1: i32) -> (i32, i32) {
    %c0_i32 = arith.constant 0 : i32
    %c0_i32_0 = arith.constant 0 : i32
    %c0_i32_1 = arith.constant 0 : i32
    return %c0_i32, %c0_i32_0 : i32, i32
  }
  func.func @transform_3(%arg0: i32, %arg1: i32) -> (i32, i32, i32) {
    %c0_i32 = arith.constant 0 : i32
    %c0_i32_0 = arith.constant 0 : i32
    return %arg0, %c0_i32, %arg1 : i32, i32, i32
  }
}

module attributes {stable_mosaic.version = 11 : i64} {
  func.func @kernel(%arg0: i32, %arg1: i32, %arg2: memref<1x72x1152xf32, #tpu.memory_space<vmem>>, %arg3: memref<3x72xf32, #tpu.memory_space<vmem>>, %arg4: memref<3x1xf32, #tpu.memory_space<vmem>>, %arg5: memref<1x3x1152xf32, #tpu.memory_space<vmem>>) attributes {dimension_semantics = [#tpu.dimension_semantics<parallel>, #tpu.dimension_semantics<parallel>], iteration_bounds = array<i64: 2, 1>, scalar_prefetch = 0 : i64, scratch_operands = 0 : i64, tpu.core_type = #tpu.core_type<tc>, window_params = [{transform_indices = @transform_0, window_bounds = array<i64: 1, 72, 1152>}, {pipeline_mode = #tpu.pipeline_mode<synchronous>, transform_indices = @transform_1, window_bounds = array<i64: 3, 72>}, {pipeline_mode = #tpu.pipeline_mode<synchronous>, transform_indices = @transform_2, window_bounds = array<i64: 3, 1>}, {transform_indices = @transform_3, window_bounds = array<i64: 1, 3, 1152>}]} {
    %c0 = arith.constant 0 : index
    %c0_0 = arith.constant 0 : index
    %0 = vector.load %arg3[%c0, %c0_0] : memref<3x72xf32, #tpu.memory_space<vmem>>, vector<3x72xf32>
    %c0_1 = arith.constant 0 : index
    %c0_2 = arith.constant 0 : index
    %c0_3 = arith.constant 0 : index
    %1 = vector.load %arg2[%c0_1, %c0_2, %c0_3] : memref<1x72x1152xf32, #tpu.memory_space<vmem>>, vector<1x72x1152xf32>
    %2 = vector.shape_cast %1 : vector<1x72x1152xf32> to vector<72x1152xf32>
    %cst = arith.constant dense<0.000000e+00> : vector<3x1152xf32>
    %3 = tpu.matmul %0, %2, %cst {dimension_numbers = #tpu.dot_dimension_numbers<[1], [0], [0], [1], [0, 0, 1, 1], [], []>} : vector<3x72xf32>, vector<72x1152xf32>, vector<3x1152xf32> -> vector<3x1152xf32>
    %c0_4 = arith.constant 0 : index
    %c0_5 = arith.constant 0 : index
    %4 = vector.load %arg4[%c0_4, %c0_5] : memref<3x1xf32, #tpu.memory_space<vmem>>, vector<3x1xf32>
    %5 = vector.broadcast %4 : vector<3x1xf32> to vector<3x1152xf32>
    %6 = arith.addf %3, %5 : vector<3x1152xf32>
    %7 = math.tanh %6 : vector<3x1152xf32>
    %c0_6 = arith.constant 0 : index
    %c0_7 = arith.constant 0 : index
    %c0_8 = arith.constant 0 : index
    %8 = vector.load %arg5[%c0_6, %c0_7, %c0_8] : memref<1x3x1152xf32, #tpu.memory_space<vmem>>, vector<1x3x1152xf32>
    %9 = vector.shape_cast %8 : vector<1x3x1152xf32> to vector<3x1152xf32>
    %10 = vector.shape_cast %7 : vector<3x1152xf32> to vector<1x3x1152xf32>
    tpu.vector_store %arg5[%c0_6, %c0_7, %c0_8], %10 {strides = array<i32>} : memref<1x3x1152xf32, #tpu.memory_space<vmem>>, vector<1x3x1152xf32>,
    return
  }
  func.func @transform_0(%arg0: i32, %arg1: i32) -> (i32, i32, i32) {
    %c0_i32 = arith.constant 0 : i32
    %c0_i32_0 = arith.constant 0 : i32
    return %arg0, %c0_i32, %arg1 : i32, i32, i32
  }
  func.func @transform_1(%arg0: i32, %arg1: i32) -> (i32, i32) {
    %c0_i32 = arith.constant 0 : i32
    %c0_i32_0 = arith.constant 0 : i32
    %c0_i32_1 = arith.constant 0 : i32
    return %c0_i32, %c0_i32_0 : i32, i32
  }
  func.func @transform_2(%arg0: i32, %arg1: i32) -> (i32, i32) {
    %c0_i32 = arith.constant 0 : i32
    %c0_i32_0 = arith.constant 0 : i32
    %c0_i32_1 = arith.constant 0 : i32
    return %c0_i32, %c0_i32_0 : i32, i32
  }
  func.func @transform_3(%arg0: i32, %arg1: i32) -> (i32, i32, i32) {
    %c0_i32 = arith.constant 0 : i32
    %c0_i32_0 = arith.constant 0 : i32
    return %arg0, %c0_i32, %arg1 : i32, i32, i32
  }
}

</mosaic_0001>

<bundles_post_ra>
// kernel: dcgan_generator_forward.23
= control target key start
LH: loop header
LB: loop body
LE: loop exit
PB: predicated region body
PF: predicated region fallthrough
CT: control target
= control target key end

     0   :  { %8 = vsyncpa [#allocation3], 0  ;;  %s644_s0 = inlined_call_operand.hbm [shape: f32[2,16], index: 0, kind: input, shape index: {}]   ;;  %s645_s1 = inlined_call_operand.hbm [shape: f32[16,1024], index: 1, kind: input, shape index: {}]   ;;  %s646_s2 = inlined_call_operand.hbm [shape: f32[1,1024], index: 2, kind: input, shape index: {}]   ;;  %s647_s3 = inlined_call_operand.vmem [shape: f32[2,1024], index: 3, kind: output, shape index: {}]  }
   0x1   :  { %9 = vsyncpa [#allocation5], 0  ;;  %s571_s12 = smov [#allocation4]   ;;  %s501_s16 = scalar_lea.hbm %s645_s1, 2048 }
   0x2   :  { %s25_s13 = sshll.u32 %s571_s12, 4  ;;  %p502_p0 = scmp.ne.s32.totalorder %s645_s1, %s501_s16  ;;  %s26_s13 = int_to_ptr.vmem [resolvable:$true] %s25_s13 }
   0x3   :  { %p505_p1 = scmp.lt.u32.totalorder %s501_s16, %s645_s1 }
   0x5   :  { %p507_p2 = pnand %p505_p1, %p502_p0 }
   0x7   :  { %510 = shalt.err (!%p507_p2)
}
   0x8   :  { %s511_s21 = scalar_lea.vmem %s26_s13, 2048  ;;  %p516_p4 = scmp.lt.s32.totalorder %s26_s13, %s26_s13 }
   0x9   :  { %p512_p3 = scmp.ne.s32.totalorder %s26_s13, %s511_s21  ;;  %p517_p5 = scmp.lt.s32.totalorder %s511_s21, %s511_s21 }
   0xb   :  { %p518_p6 = por %p517_p5, %p516_p4 }
   0xd   :  { %p519_p7 = pnand %p518_p6, %p512_p3 }
   0xf   :  { %522 = shalt.err (!%p519_p7)
}
  0x10   :  { %s572_s22 = smov 1024   ;;  %s573_s23 = smov 64  }
  0x11   :  { %31 = dma.hbm_to_vmem [thread:$0]  %s645_s1, 2048, %s26_s13, [#allocation5], %s572_s22, %s572_s22, %s573_s23  }
  0x12   :  { %s574_s26 = smov [#allocation2]   ;;  %s575_s28 = smov [#allocation6]  }
  0x13   :  { %s16_s27 = sshll.u32 %s574_s26, 4  ;;  %s38_s29 = sshll.u32 %s575_s28, 4  ;;  %s17_s27 = int_to_ptr.vmem [resolvable:$true] %s16_s27  ;;  %s39_s29 = int_to_ptr.vmem [resolvable:$true] %s38_s29 }
  0x14   :  { %s523_s5 = scalar_lea.hbm %s644_s0, 32 }
  0x15   :  { %p524_p8 = scmp.ne.s32.totalorder %s644_s0, %s523_s5  ;;  %p527_p9 = scmp.lt.u32.totalorder %s523_s5, %s644_s0 }
  0x17   :  { %p529_p10 = pnand %p527_p9, %p524_p8 }
  0x19   :  { %532 = shalt.err (!%p529_p10)
}
  0x1a   :  { %s533_s1 = scalar_lea.vmem %s17_s27, 32  ;;  %p538_p12 = scmp.lt.s32.totalorder %s17_s27, %s17_s27 }
  0x1b   :  { %p534_p11 = scmp.ne.s32.totalorder %s17_s27, %s533_s1  ;;  %p539_p13 = scmp.lt.s32.totalorder %s533_s1, %s533_s1 }
  0x1d   :  { %p540_p0 = por %p539_p13, %p538_p12 }
  0x1f   :  { %p541_p1 = pnand %p540_p0, %p534_p11 }
  0x21   :  { %544 = shalt.err (!%p541_p1)
}
  0x22   :  { %19 = dma.hbm_to_vmem [thread:$0]  %s644_s0, 32, %s17_s27, [#allocation3]  }
  0x23   :  { %s545_s14 = scalar_lea.hbm %s646_s2, 128 }
  0x24   :  { %p546_p2 = scmp.ne.s32.totalorder %s646_s2, %s545_s14  ;;  %p549_p3 = scmp.lt.u32.totalorder %s545_s14, %s646_s2 }
  0x26   :  { %p551_p4 = pnand %p549_p3, %p546_p2 }
  0x28   :  { %554 = shalt.err (!%p551_p4)
}
  0x29   :  { %s555_s19 = scalar_lea.vmem %s39_s29, 128  ;;  %p560_p6 = scmp.lt.s32.totalorder %s39_s29, %s39_s29 }
  0x2a   :  { %p556_p5 = scmp.ne.s32.totalorder %s39_s29, %s555_s19  ;;  %p561_p7 = scmp.lt.s32.totalorder %s555_s19, %s555_s19 }
  0x2c   :  { %p562_p8 = por %p561_p7, %p560_p6 }
  0x2e   :  { %p563_p9 = pnand %p562_p8, %p556_p5 }
  0x30   :  { %566 = shalt.err (!%p563_p9)
}
  0x31   :  { %41 = dma.hbm_to_vmem [thread:$0]  %s646_s2, 128, %s39_s29, [#allocation5]  }
  0x32   :  { %567 = dma.done.wait [#allocation3], 32  }
  0x33   :  { %568 = vsyncadd [#allocation3], 4294967264 }
  0x34   :  { %569 = dma.done.wait [#allocation5], 2176  }
  0x35   :  { %570 = vsyncadd [#allocation5], 4294965120  ;;  %v576_v0 = vmov 0.0   ;;  %v53_v1 = vld [vmem:[#allocation4 + $0x8] sm:$0xff]  ;;  %v55_v3 = vld [vmem:[#allocation4 + $0x18] sm:$0xff]  ;;  %vm110_vm0 = vcmask 130048   ;;  %v70_v26 = vlaneseq }
  0x36   :  { %178 = vmatprep.mubr.f32.mxu0 %v576_v0  ;;  %249 = vmatprep.mubr.f32.mxu1 %v576_v0  ;;  %v61_v2 = vld [vmem:[#allocation4 + $0x48] sm:$0xff]  ;;  %v63_v5 = vld [vmem:[#allocation4 + $0x58] sm:$0xff]  ;;  %v52_v6 = vld [vmem:[#allocation4] sm:$0xff]  ;;  %v577_v34 = vmov 1983009808  }
  0x37   :  { %v478_v4 = vpack.c.bf16 %v61_v2, %v53_v1  ;;  %v60_v7 = vld [vmem:[#allocation4 + $0x40] sm:$0xff]  ;;  %v482_v8 = vpack.c.bf16 %v63_v5, %v55_v3  ;;  %v54_v10 = vld [vmem:[#allocation4 + $0x10] sm:$0xff]  ;;  %v51_v12 = vld [vmem:[#allocation2] sm:$0x3]  ;;  %v71_v27 = vshrl.u32 %v70_v26, 7  ;;  %v433_v35 = vunpack.c.l.s4 %v577_v34 }
  0x38   :  { %v480_v9 = vpack.c.bf16 %v60_v7, %v52_v6  ;;  %v62_v11 = vld [vmem:[#allocation4 + $0x50] sm:$0xff]  ;;  %v57_v14 = vld [vmem:[#allocation4 + $0x28] sm:$0xff]  ;;  %v59_v16 = vld [vmem:[#allocation4 + $0x38] sm:$0xff] }
  0x39   :  { %479 = vmatprep.subr.bf16.mxu0 %v478_v4  ;;  %v484_v13 = vpack.c.bf16 %v62_v11, %v54_v10  ;;  %v65_v15 = vld [vmem:[#allocation4 + $0x68] sm:$0xff]  ;;  %483 = vmatprep.subr.bf16.mxu1 %v482_v8  ;;  %v67_v18 = vld [vmem:[#allocation4 + $0x78] sm:$0xff]  ;;  %v56_v19 = vld [vmem:[#allocation4 + $0x20] sm:$0xff]  ;;  %v72_v28 = vsub.s32 0, %v71_v27  ;;  %v80_v30 = vsub.s32 2, %v71_v27  ;;  %v76_v31 = vsub.s32 1, %v71_v27 }
  0x3a   :  { %481 = vmatpush1.bf16.msra.mxu0 %v480_v9  ;;  %v486_v17 = vpack.c.bf16 %v65_v15, %v57_v14  ;;  %v64_v20 = vld [vmem:[#allocation4 + $0x60] sm:$0xff]  ;;  %v490_v21 = vpack.c.bf16 %v67_v18, %v59_v16  ;;  %v58_v23 = vld [vmem:[#allocation4 + $0x30] sm:$0xff]  ;;  %v84_v32 = vsub.s32 3, %v71_v27  ;;  %v88_v36 = vsub.s32 4, %v71_v27 }
  0x3b   :  { %485 = vmatpush1.bf16.msra.mxu1 %v484_v13  ;;  %v488_v22 = vpack.c.bf16 %v64_v20, %v56_v19  ;;  %v66_v24 = vld [vmem:[#allocation4 + $0x70] sm:$0xff]  ;;  %v68_v29 = vld [vmem:[#allocation6] sm:$0xff]  ;;  %v96_v39 = vsub.s32 6, %v71_v27  ;;  %v92_v40 = vsub.s32 5, %v71_v27  ;;  %v100_v42 = vsub.s32 7, %v71_v27 }
  0x3c   :  { %487 = vmatprep.subr.bf16.mxu0 %v486_v17  ;;  %v492_v25 = vpack.c.bf16 %v66_v24, %v58_v23  ;;  %491 = vmatprep.subr.bf16.mxu1 %v490_v21  ;;  %v73_v33 = vrot.slane %v68_v29, %v72_v28  ;;  %v81_v37 = vrot.slane %v68_v29, %v80_v30  ;;  %v434_v47 = vunpack.c.0.s8 %v433_v35 }
  0x3d   :  { %474 = vmatmul.mubr.msk.f32.vlgmr.msra.gmra.mrb[0].mxu0 %vm110_vm0, %v51_v12  ;;  %v77_v38 = vrot.slane %v68_v29, %v76_v31  ;;  %v85_v41 = vrot.slane %v68_v29, %v84_v32  ;;  %v89_v48 = vrot.slane %v68_v29, %v88_v36  ;;  %v97_v52 = vrot.slane %v68_v29, %v96_v39 }
  0x3e   :  { %475 = vmatmul.mubr.msk.f32.vlgmr.msra.gmra.mrb[0].mxu1 %vm110_vm0, %v51_v12  ;;  %489 = vmatpush1.bf16.msra.mxu0 %v488_v22  ;;  %v93_v53 = vrot.slane %v68_v29, %v92_v40  ;;  %v101_v56 = vrot.slane %v68_v29, %v100_v42  ;;  %v437_v60 = vsub.s32 %v434_v47, %v71_v27 }
  0x3f   :  { %493 = vmatpush1.bf16.msra.mxu1 %v492_v25  ;;  %320 = vmatprep.mubr.f32.mxu0 %v576_v0 }
  0x40   :  { %391 = vmatprep.mubr.f32.mxu1 %v576_v0 }
  0x41   :  { %476 = vmatmul.mubr.msk.f32.vlgmr.msra.gmra.mrb[2].mxu0 %vm110_vm0, %v51_v12 }
  0x42   :  { %477 = vmatmul.mubr.msk.f32.vlgmr.msra.gmra.mrb[2].mxu1 %vm110_vm0, %v51_v12 }
 0x110   :  { %v180_v43 = vpop.f32.mrb[0].mxu0 }
 0x111   :  { %v181_v44 = vadd.f32 %v180_v43, %v73_v33  ;;  %v251_v45 = vpop.f32.mrb[0].mxu1  ;;  %v182_v46 = vpop.f32.mrb[1].mxu0 }
 0x112   :  { %v252_v49 = vadd.f32 %v251_v45, %v81_v37  ;;  %v183_v50 = vadd.f32 %v182_v46, %v77_v38  ;;  %v253_v51 = vpop.f32.mrb[1].mxu1 }
 0x113   :  { %vm398_vm1 = vcmp.ge.f32.partialorder %v181_v44, 0.0  ;;  %v406_v54 = vmul.f32 0.2, %v181_v44  ;;  %v254_v55 = vadd.f32 %v253_v51, %v85_v41 }
 0x114   :  { %vm400_vm2 = vcmp.ge.f32.partialorder %v252_v49, 0.0  ;;  %v408_v57 = vmul.f32 0.2, %v252_v49  ;;  %vm399_vm3 = vcmp.ge.f32.partialorder %v183_v50, 0.0  ;;  %v407_v58 = vmul.f32 0.2, %v183_v50 }
 0x115   :  { %v414_v59 = vsel %vm398_vm1, %v181_v44, %v406_v54  ;;  %vm401_vm4 = vcmp.ge.f32.partialorder %v254_v55, 0.0  ;;  %v409_v61 = vmul.f32 0.2, %v254_v55  ;;  %v322_v62 = vpop.f32.mrb[2].mxu0  ;;  %v393_v63 = vpop.f32.mrb[2].mxu1 }
 0x116   :  { %v416_v0 = vsel %vm400_vm2, %v252_v49, %v408_v57  ;;  %v415_v1 = vsel %vm399_vm3, %v183_v50, %v407_v58  ;;  %v323_v2 = vadd.f32 %v322_v62, %v89_v48  ;;  %v394_v3 = vadd.f32 %v393_v63, %v97_v52  ;;  %v324_v4 = vpop.f32.mrb[3].mxu0  ;;  %v395_v5 = vpop.f32.mrb[3].mxu1 }
 0x117   :  { %v430_v6 = vcombine.low %v414_v59, %v415_v1  ;;  %v417_v7 = vsel %vm401_vm4, %v254_v55, %v409_v61  ;;  %v325_v8 = vadd.f32 %v324_v4, %v93_v53  ;;  %v396_v9 = vadd.f32 %v395_v5, %v101_v56 }
 0x118   :  { %v431_v10 = vcombine.low %v416_v0, %v417_v7  ;;  %vm402_vm5 = vcmp.ge.f32.partialorder %v323_v2, 0.0  ;;  %v410_v11 = vmul.f32 0.2, %v323_v2  ;;  %vm404_vm6 = vcmp.ge.f32.partialorder %v394_v3, 0.0 }
 0x119   :  { %v438_v12 = vrot.slane %v430_v6, %v437_v60  ;;  %v412_v13 = vmul.f32 0.2, %v394_v3  ;;  %vm403_vm7 = vcmp.ge.f32.partialorder %v325_v8, 0.0  ;;  %v411_v14 = vmul.f32 0.2, %v325_v8 }
 0x11a   :  { %v445_v15 = vrot.slane %v431_v10, %v437_v60  ;;  %v418_v16 = vsel %vm402_vm5, %v323_v2, %v410_v11  ;;  %vm405_vm8 = vcmp.ge.f32.partialorder %v396_v9, 0.0  ;;  %v413_v17 = vmul.f32 0.2, %v396_v9 }
 0x11b   :  { %v420_v18 = vsel %vm404_vm6, %v394_v3, %v412_v13  ;;  %v419_v19 = vsel %vm403_vm7, %v325_v8, %v411_v14 }
 0x11c   :  { %v446_v20 = vcombine.low %v438_v12, %v445_v15  ;;  %v447_v21 = vcombine.low %v418_v16, %v419_v19  ;;  %v421_v22 = vsel %vm405_vm8, %v396_v9, %v413_v17 }
 0x11d   :  { %v448_v23 = vcombine.low %v420_v18, %v421_v22 }
 0x11e   :  { %466 = vst [vmem:[%s647_s3] sm:$0xff] %v446_v20  ;;  %v455_v24 = vrot.slane %v447_v21, %v437_v60 }
 0x11f   :  { %v462_v25 = vrot.slane %v448_v23, %v437_v60 }
 0x121   :  { %v463_v26 = vcombine.low %v455_v24, %v462_v25 }
 0x123   :  { %467 = vst [vmem:[%s647_s3 + $0x8] sm:$0xff] %v463_v26 }
 0x124   :  { %472 = vsyncpa [#allocation3], 1 }
 0x125   :  { %473 = vsyncpa [#allocation5], 1 }

// kernel: dcgan_generator_forward.24
= control target key start
LH: loop header
LB: loop body
LE: loop exit
PB: predicated region body
PF: predicated region fallthrough
CT: control target
= control target key end

     0   :  { %s616_s12 = smov 0   ;;  %s618_s13 = smov 0   ;;  %s727_s0 = inlined_call_operand.vmem [shape: f32[2,256,16], index: 0, kind: input, shape index: {}]   ;;  %s728_s1 = inlined_call_operand.vmem [shape: f32[32,256], index: 1, kind: input, shape index: {}]   ;;  %s729_s2 = inlined_call_operand.vmem [shape: f32[32,1], index: 2, kind: input, shape index: {}]   ;;  %s730_s3 = inlined_call_operand.vmem [shape: f32[2,32,16], index: 3, kind: output, shape index: {}]  }
   0x1   :  { %s620_s14 = smov 0  }
   0x2 LB: > { %s25_s15 = sadd.s32 1, %s589_s13  ;;  %p443_p0 = scmp.ge.s32.totalorder %s593_s14, 1  ;;  %s593_s14 = sphi %s620_s14, %s13_s14   ;;  %s589_s13 = sphi %s618_s13, %s732_s13   ;;  %s585_s12 = sphi %s616_s12, %s731_s12  }
   0x3   : > { %p27_p1 = scmp.ge.s32.totalorder %s25_s15, 2  ;;  %p156_p2 = scmp.lt.s32.totalorder %s593_s14, 3 }
   0x5   : > { %s734_s15 = smov (%p27_p1, %s25_s15), 0  ;;  %p157_p3 = pnand %p443_p0, %p156_p2 }
   0x6   : > { %p186_p4 = scmp.lt.s32.totalorder (!%p157_p3), %s585_s12, 1  ;;  %v203_v0 = vld [vmem:[%s728_s1 + $0x8] sm:$0xff] (!%p157_p3)  ;;  %v595_v2 = vmov (!%p157_p3), 0   ;;  %v244_v3 = vld [vmem:[%s729_s2 + $0x10] sm:$0xff] (!%p157_p3)  ;;  %v242_v4 = vld [vmem:[%s729_s2] sm:$0xff] (!%p157_p3)  ;;  %vm351_vm0 = vcmask (!%p157_p3), 130048  }
   0x7   : > { %160 = sbr.rel (%p157_p3) target bundleno = 274 (0x112), region = 32  ;;  %v207_v1 = vld [vmem:[%s728_s1 + $0x28] sm:$0xff] (!%p157_p3)  ;;  %330 = vmatprep.mubr.f32.mxu0 (!%p157_p3), %v203_v0  ;;  %570 = vset.pattern.permute.xlu1 (!%p157_p3), %v595_v2  ;;  %v245_v5 = vld [vmem:[%s729_s2 + $0x18] sm:$0xff] (!%p157_p3)  ;;  %v202_v55 = vld [vmem:[%s728_s1] sm:$0xff] (!%p157_p3) }
   0x8   : > { %340 = vmatprep.mubr.f32.mxu1 (!%p157_p3), %v207_v1  ;;  %569 = vset.pattern.permute.xlu0 (!%p157_p3), %v595_v2  ;;  %v243_v6 = vld [vmem:[%s729_s2 + $0x8] sm:$0xff] (!%p157_p3)  ;;  %v206_v56 = vld [vmem:[%s728_s1 + $0x20] sm:$0xff] (!%p157_p3)  ;;  %v205_v57 = vld [vmem:[%s728_s1 + $0x18] sm:$0xff] (!%p157_p3) }
   0x9   : > { %258 = vperm.xlu1 (!%p157_p3), %570, %v244_v3   ;;  %248 = vperm.xlu0 (!%p157_p3), %569, %v242_v4   ;;  %v209_v58 = vld [vmem:[%s728_s1 + $0x38] sm:$0xff] (!%p157_p3)  ;;  %v204_v59 = vld [vmem:[%s728_s1 + $0x10] sm:$0xff] (!%p157_p3) }
   0xa   : > { %v208_v60 = vld [vmem:[%s728_s1 + $0x30] sm:$0xff] (!%p157_p3) }
   0xd   : > { %263 = vperm.xlu1 (!%p157_p3), %570, %v245_v5   ;;  %253 = vperm.xlu0 (!%p157_p3), %569, %v243_v6  }
   0xe   : > { %s736_s12 = smov (!%p186_p4, %s585_s12), 1 }
   0xf   : > { %s450_s24 = sshll.u32 %s736_s12, 8  ;;  %s451_s21 = sshll.u32 %s736_s12, 5 }
  0x10   : > { %s655_s29 = scalar_lea.vmem %s727_s0, %s450_s24  ;;  %s201_s24 = scalar_lea.vmem %s730_s3, %s451_s21 }
  0x11   : > { %v226_v7 = vld [vmem:[%s655_s29 + $0x80] sm:$0xff]  ;;  %v227_v8 = vld [vmem:[%s655_s29 + $0x88] sm:$0xff]  ;;  %v228_v12 = vld [vmem:[%s655_s29 + $0x90] sm:$0xff] }
  0x12   : > { %v210_v9 = vld [vmem:[%s655_s29] sm:$0xff]  ;;  %v496_v10 = vpack.c.bf16 %v227_v8, %v226_v7  ;;  %v211_v11 = vld [vmem:[%s655_s29 + $0x8] sm:$0xff]  ;;  %v229_v13 = vld [vmem:[%s655_s29 + $0x98] sm:$0xff] }
  0x13   : > { %v498_v14 = vpack.c.bf16 %v211_v11, %v210_v9  ;;  %v500_v15 = vpack.c.bf16 %v229_v13, %v228_v12  ;;  %v212_v16 = vld [vmem:[%s655_s29 + $0x10] sm:$0xff]  ;;  %v213_v17 = vld [vmem:[%s655_s29 + $0x18] sm:$0xff]  ;;  %v230_v18 = vld [vmem:[%s655_s29 + $0xa0] sm:$0xff] }
  0x14   : > { %497 = vmatprep.subr.bf16.mxu0 %v496_v10  ;;  %528 = vmatprep.subr.bf16.mxu1 %v496_v10  ;;  %v231_v19 = vld [vmem:[%s655_s29 + $0xa8] sm:$0xff]  ;;  %v502_v20 = vpack.c.bf16 %v213_v17, %v212_v16  ;;  %v214_v22 = vld [vmem:[%s655_s29 + $0x20] sm:$0xff]  ;;  %v232_v24 = vld [vmem:[%s655_s29 + $0xb0] sm:$0xff] }
  0x15   : > { %499 = vmatpush3.bf16.msra.mxu0 %v498_v14  ;;  %536 = vmatpush3.bf16.msra.mxu1 %v498_v14  ;;  %v504_v21 = vpack.c.bf16 %v231_v19, %v230_v18  ;;  %v215_v23 = vld [vmem:[%s655_s29 + $0x28] sm:$0xff]  ;;  %v233_v25 = vld [vmem:[%s655_s29 + $0xb8] sm:$0xff]  ;;  %v216_v28 = vld [vmem:[%s655_s29 + $0x30] sm:$0xff] }
  0x16   : > { %501 = vmatprep.subr.bf16.mxu0 %v500_v15  ;;  %529 = vmatprep.subr.bf16.mxu1 %v500_v15  ;;  %v506_v26 = vpack.c.bf16 %v215_v23, %v214_v22  ;;  %v508_v27 = vpack.c.bf16 %v233_v25, %v232_v24  ;;  %v217_v29 = vld [vmem:[%s655_s29 + $0x38] sm:$0xff]  ;;  %v234_v30 = vld [vmem:[%s655_s29 + $0xc0] sm:$0xff]  ;;  %v235_v31 = vld [vmem:[%s655_s29 + $0xc8] sm:$0xff] }
  0x17   : > { %v510_v32 = vpack.c.bf16 %v217_v29, %v216_v28  ;;  %v512_v33 = vpack.c.bf16 %v235_v31, %v234_v30  ;;  %v218_v34 = vld [vmem:[%s655_s29 + $0x40] sm:$0xff]  ;;  %v219_v35 = vld [vmem:[%s655_s29 + $0x48] sm:$0xff]  ;;  %v236_v36 = vld [vmem:[%s655_s29 + $0xd0] sm:$0xff] }
  0x18   : > { %v237_v37 = vld [vmem:[%s655_s29 + $0xd8] sm:$0xff]  ;;  %v514_v38 = vpack.c.bf16 %v219_v35, %v218_v34  ;;  %v220_v40 = vld [vmem:[%s655_s29 + $0x50] sm:$0xff]  ;;  %v238_v42 = vld [vmem:[%s655_s29 + $0xe0] sm:$0xff] }
  0x19   : > { %503 = vmatpush3.bf16.msra.mxu0 %v502_v20  ;;  %537 = vmatpush3.bf16.msra.mxu1 %v502_v20  ;;  %v516_v39 = vpack.c.bf16 %v237_v37, %v236_v36  ;;  %v221_v41 = vld [vmem:[%s655_s29 + $0x58] sm:$0xff]  ;;  %v239_v43 = vld [vmem:[%s655_s29 + $0xe8] sm:$0xff]  ;;  %v222_v46 = vld [vmem:[%s655_s29 + $0x60] sm:$0xff] }
  0x1a   : > { %505 = vmatprep.subr.bf16.mxu0 %v504_v21  ;;  %530 = vmatprep.subr.bf16.mxu1 %v504_v21  ;;  %v518_v44 = vpack.c.bf16 %v221_v41, %v220_v40  ;;  %v520_v45 = vpack.c.bf16 %v239_v43, %v238_v42  ;;  %v223_v47 = vld [vmem:[%s655_s29 + $0x68] sm:$0xff]  ;;  %v240_v48 = vld [vmem:[%s655_s29 + $0xf0] sm:$0xff]  ;;  %v241_v49 = vld [vmem:[%s655_s29 + $0xf8] sm:$0xff] }
  0x1b   : > { %v522_v50 = vpack.c.bf16 %v223_v47, %v222_v46  ;;  %v524_v51 = vpack.c.bf16 %v241_v49, %v240_v48  ;;  %v224_v52 = vld [vmem:[%s655_s29 + $0x70] sm:$0xff]  ;;  %v225_v53 = vld [vmem:[%s655_s29 + $0x78] sm:$0xff] }
  0x1c   : > { %v526_v54 = vpack.c.bf16 %v225_v53, %v224_v52 }
  0x1d   : > { %507 = vmatpush3.bf16.msra.mxu0 %v506_v26  ;;  %538 = vmatpush3.bf16.msra.mxu1 %v506_v26 }
  0x1e   : > { %509 = vmatprep.subr.bf16.mxu0 %v508_v27  ;;  %531 = vmatprep.subr.bf16.mxu1 %v508_v27 }
  0x21   : > { %511 = vmatpush3.bf16.msra.mxu0 %v510_v32  ;;  %539 = vmatpush3.bf16.msra.mxu1 %v510_v32 }
  0x22   : > { %513 = vmatprep.subr.bf16.mxu0 %v512_v33  ;;  %532 = vmatprep.subr.bf16.mxu1 %v512_v33 }
  0x25   : > { %515 = vmatpush3.bf16.msra.mxu0 %v514_v38  ;;  %540 = vmatpush3.bf16.msra.mxu1 %v514_v38 }
  0x26   : > { %517 = vmatprep.subr.bf16.mxu0 %v516_v39  ;;  %533 = vmatprep.subr.bf16.mxu1 %v516_v39 }
  0x29   : > { %519 = vmatpush3.bf16.msra.mxu0 %v518_v44  ;;  %541 = vmatpush3.bf16.msra.mxu1 %v518_v44 }
  0x2a   : > { %521 = vmatprep.subr.bf16.mxu0 %v520_v45  ;;  %534 = vmatprep.subr.bf16.mxu1 %v520_v45 }
  0x2d   : > { %523 = vmatpush3.bf16.msra.mxu0 %v522_v50  ;;  %542 = vmatpush3.bf16.msra.mxu1 %v522_v50 }
  0x2e   : > { %525 = vmatprep.subr.bf16.mxu0 %v524_v51  ;;  %535 = vmatprep.subr.bf16.mxu1 %v524_v51 }
  0x31   : > { %527 = vmatpush3.bf16.msra.mxu0 %v526_v54  ;;  %543 = vmatpush3.bf16.msra.mxu1 %v526_v54 }
  0x34   : > { %331 = vmatmul.mubr.f32.vlgmr.msra.gmra.mrb[0].mxu0 %v202_v55  ;;  %341 = vmatmul.mubr.f32.vlgmr.msra.gmra.mrb[0].mxu1 %v206_v56 }
  0x35   : > { %335 = vmatprep.mubr.f32.mxu0 %v205_v57  ;;  %345 = vmatprep.mubr.f32.mxu1 %v209_v58 }
  0x38   : > { %336 = vmatmul.mubr.f32.gmra.mrb[2].mxu0 %v204_v59  ;;  %346 = vmatmul.mubr.f32.gmra.mrb[2].mxu1 %v208_v60 }
  0x88   : > { %v259_v61 = vpop.permute.xlu1 %258  ;;  %v249_v62 = vpop.permute.xlu0 %248 }
  0x8c   : > { %v264_v13 = vpop.permute.xlu1 %263  ;;  %v254_v14 = vpop.permute.xlu0 %253 }
 0x107   : > { %v484_v63 = vpop.f32.mrb[0].mxu0  ;;  %v490_v0 = vpop.f32.mrb[0].mxu1 }
 0x108   : > { %v485_v1 = vpop.f32.mrb[1].mxu0  ;;  %v491_v2 = vpop.f32.mrb[1].mxu1 }
 0x109   : > { %v486_v3 = vadd.f32 %v485_v1, %v484_v63  ;;  %v492_v4 = vadd.f32 %v491_v2, %v490_v0 }
 0x10b   : > { %v333_v5 = vadd.f32 %v486_v3, %v249_v62  ;;  %v343_v6 = vadd.f32 %v492_v4, %v259_v61  ;;  %v487_v7 = vpop.f32.mrb[2].mxu0  ;;  %v493_v8 = vpop.f32.mrb[2].mxu1 }
 0x10c   : > { %v488_v9 = vpop.f32.mrb[3].mxu0  ;;  %v494_v10 = vpop.f32.mrb[3].mxu1 }
 0x10d   : > { %352 = vst.msk [vmem:[%s201_s24] sm:$0xff] %vm351_vm0, %v333_v5  ;;  %354 = vst.msk [vmem:[%s201_s24 + $0x10] sm:$0xff] %vm351_vm0, %v343_v6  ;;  %v489_v11 = vadd.f32 %v488_v9, %v487_v7  ;;  %v495_v12 = vadd.f32 %v494_v10, %v493_v8 }
 0x10f   : > { %v338_v15 = vadd.f32 %v489_v11, %v254_v14  ;;  %v348_v16 = vadd.f32 %v495_v12, %v264_v13 }
 0x111   : > { %353 = vst.msk [vmem:[%s201_s24 + $0x8] sm:$0xff] %vm351_vm0, %v338_v15  ;;  %355 = vst.msk [vmem:[%s201_s24 + $0x18] sm:$0xff] %vm351_vm0, %v348_v16 }
 0x112 PF: > { %s13_s14 = sadd.s32 1, %s593_s14   ;;  %s731_s12 = smov %s589_s13 }
 0x113   : > { %p10_p5 = scmp.ge.s32.totalorder %s13_s14, 4   ;;  %s732_s13 = smov %s734_s15 }
 0x115   :  { %12 = sbr.rel (!%p10_p5) target bundleno = 2 (0x2), region = 62 }

// kernel: dcgan_generator_forward.28
= control target key start
LH: loop header
LB: loop body
LE: loop exit
PB: predicated region body
PF: predicated region fallthrough
CT: control target
= control target key end

     0   :  { %s347_s9 = smov 0   ;;  %s349_s10 = smov 0   ;;  %s465_s0 = inlined_call_operand.vmem [shape: f32[2,32,64], index: 0, kind: input, shape index: {}]   ;;  %s466_s1 = inlined_call_operand.vmem [shape: f32[32,1], index: 1, kind: output, shape index: {0}]   ;;  %s467_s2 = inlined_call_operand.vmem [shape: f32[32,1], index: 2, kind: output, shape index: {1}]  }
   0x1   :  { %s351_s11 = smov 0  }
   0x2 LB: > { %s25_s12 = sadd.s32 1, %s325_s10  ;;  %p274_p0 = scmp.ge.s32.totalorder %s329_s11, 1  ;;  %s329_s11 = sphi %s351_s11, %s13_s11   ;;  %s325_s10 = sphi %s349_s10, %s469_s10   ;;  %s321_s9 = sphi %s347_s9, %s468_s9  }
   0x3   : > { %p27_p1 = scmp.ge.s32.totalorder %s25_s12, 2  ;;  %p122_p2 = scmp.lt.s32.totalorder %s329_s11, 3 }
   0x5   : > { %s471_s12 = smov (%p27_p1, %s25_s12), 0  ;;  %p123_p3 = pnand %p274_p0, %p122_p2 }
   0x6   : > { %p142_p4 = scmp.lt.s32.totalorder (!%p123_p3), %s321_s9, 1  ;;  %p150_p5 = scmp.eq.s32.totalorder (!%p123_p3), %s321_s9, 0 }
   0x7   : > { %126 = sbr.rel (%p123_p3) target bundleno = 180 (0xb4), region = 24 }
   0xe   : > { %s473_s9 = smov (!%p142_p4, %s321_s9), 1  ;;  %155 = sbr.rel (!%p150_p5) target bundleno = 21 (0x15), region = 28 }
   0xf   : > { %s280_s13 = sshll.u32 %s473_s9, 5  ;;  %vm156_vm0 = vcmask (%p150_p5), 7168   ;;  %v331_v0 = vmov (%p150_p5), 0.0  }
  0x10   : > { %s149_s16 = scalar_lea.vmem %s465_s0, %s280_s13  ;;  %157 = vst.msk [vmem:[%s466_s1] sm:$0xff] (%p150_p5), %vm156_vm0, %v331_v0  ;;  %158 = vst.msk [vmem:[%s466_s1 + $0x8] sm:$0xff] (%p150_p5), %vm156_vm0, %v331_v0 }
  0x11   : > { %159 = vst.msk [vmem:[%s466_s1 + $0x10] sm:$0xff] (%p150_p5), %vm156_vm0, %v331_v0  ;;  %160 = vst.msk [vmem:[%s466_s1 + $0x18] sm:$0xff] (%p150_p5), %vm156_vm0, %v331_v0 }
  0x12   : > { %161 = vst.msk [vmem:[%s467_s2] sm:$0xff] (%p150_p5), %vm156_vm0, %v331_v0  ;;  %162 = vst.msk [vmem:[%s467_s2 + $0x8] sm:$0xff] (%p150_p5), %vm156_vm0, %v331_v0 }
  0x13   : > { %163 = vst.msk [vmem:[%s467_s2 + $0x10] sm:$0xff] (%p150_p5), %vm156_vm0, %v331_v0  ;;  %164 = vst.msk [vmem:[%s467_s2 + $0x18] sm:$0xff] (%p150_p5), %vm156_vm0, %v331_v0 }
  0x15 PF: > { %v167_v1 = vld [vmem:[%s149_s16 + $0x10] sm:$0xff]  ;;  %vm173_vm1 = vcmask 523264   ;;  %v165_v2 = vld [vmem:[%s149_s16] sm:$0xff]  ;;  %v168_v3 = vld [vmem:[%s149_s16 + $0x18] sm:$0xff]  ;;  %vm190_vm2 = vcmask 7168  }
  0x16   : > { %v180_v4 = vsel %vm173_vm1, %v167_v1, 0.0  ;;  %v174_v5 = vsel %vm173_vm1, %v165_v2, 0.0  ;;  %v166_v6 = vld [vmem:[%s149_s16 + $0x8] sm:$0xff]  ;;  %v199_v7 = vmul.f32 %v165_v2, %v165_v2  ;;  %v183_v8 = vsel %vm173_vm1, %v168_v3, 0.0 }
  0x17   : > { %181 = vadd.xlane.f32.xlu1 %v180_v4  ;;  %175 = vadd.xlane.f32.xlu0 %v174_v5  ;;  %v177_v9 = vsel %vm173_vm1, %v166_v6, 0.0  ;;  %v200_v10 = vmul.f32 %v166_v6, %v166_v6  ;;  %v201_v11 = vmul.f32 %v167_v1, %v167_v1  ;;  %v202_v14 = vmul.f32 %v168_v3, %v168_v3  ;;  %v169_v18 = vld [vmem:[%s466_s1] sm:$0xff]  ;;  %v170_v24 = vld [vmem:[%s466_s1 + $0x8] sm:$0xff] }
  0x18   : > { %v203_v13 = vsel %vm173_vm1, %v199_v7, 0.0  ;;  %v171_v17 = vld [vmem:[%s466_s1 + $0x10] sm:$0xff]  ;;  %v172_v23 = vld [vmem:[%s466_s1 + $0x18] sm:$0xff] }
  0x19   : > { %v206_v12 = vsel %vm173_vm1, %v200_v10, 0.0  ;;  %v212_v15 = vsel %vm173_vm1, %v202_v14, 0.0  ;;  %v209_v16 = vsel %vm173_vm1, %v201_v11, 0.0  ;;  %v196_v29 = vld [vmem:[%s467_s2 + $0x8] sm:$0xff]  ;;  %v195_v30 = vld [vmem:[%s467_s2] sm:$0xff] }
  0x1a   : > { %v198_v35 = vld [vmem:[%s467_s2 + $0x18] sm:$0xff]  ;;  %v197_v36 = vld [vmem:[%s467_s2 + $0x10] sm:$0xff] }
  0x1b   : > { %184 = vadd.xlane.f32.xlu1 %v183_v8  ;;  %178 = vadd.xlane.f32.xlu0 %v177_v9 }
  0x1f   : > { %207 = vadd.xlane.f32.xlu1 %v206_v12  ;;  %204 = vadd.xlane.f32.xlu0 %v203_v13 }
  0x23   : > { %213 = vadd.xlane.f32.xlu1 %v212_v15  ;;  %210 = vadd.xlane.f32.xlu0 %v209_v16 }
  0xa4   : > { %v182_v19 = vpop.xlane.xlu1 %181  ;;  %v176_v20 = vpop.xlane.xlu0 %175 }
  0xa5   : > { %v188_v21 = vadd.f32 %v182_v19, %v171_v17  ;;  %v186_v22 = vadd.f32 %v176_v20, %v169_v18 }
  0xa7   : > { %193 = vst.msk [vmem:[%s466_s1 + $0x10] sm:$0xff] %vm190_vm2, %v188_v21  ;;  %191 = vst.msk [vmem:[%s466_s1] sm:$0xff] %vm190_vm2, %v186_v22 }
  0xa8   : > { %v185_v25 = vpop.xlane.xlu1 %184  ;;  %v179_v26 = vpop.xlane.xlu0 %178 }
  0xa9   : > { %v189_v27 = vadd.f32 %v185_v25, %v172_v23  ;;  %v187_v28 = vadd.f32 %v179_v26, %v170_v24 }
  0xab   : > { %194 = vst.msk [vmem:[%s466_s1 + $0x18] sm:$0xff] %vm190_vm2, %v189_v27  ;;  %192 = vst.msk [vmem:[%s466_s1 + $0x8] sm:$0xff] %vm190_vm2, %v187_v28 }
  0xac   : > { %v208_v31 = vpop.xlane.xlu1 %207  ;;  %v205_v32 = vpop.xlane.xlu0 %204 }
  0xad   : > { %v216_v33 = vadd.f32 %v208_v31, %v196_v29  ;;  %v215_v34 = vadd.f32 %v205_v32, %v195_v30 }
  0xaf   : > { %220 = vst.msk [vmem:[%s467_s2 + $0x8] sm:$0xff] %vm190_vm2, %v216_v33  ;;  %219 = vst.msk [vmem:[%s467_s2] sm:$0xff] %vm190_vm2, %v215_v34 }
  0xb0   : > { %v214_v37 = vpop.xlane.xlu1 %213  ;;  %v211_v38 = vpop.xlane.xlu0 %210 }
  0xb1   : > { %v218_v39 = vadd.f32 %v214_v37, %v198_v35  ;;  %v217_v40 = vadd.f32 %v211_v38, %v197_v36 }
  0xb3   : > { %222 = vst.msk [vmem:[%s467_s2 + $0x18] sm:$0xff] %vm190_vm2, %v218_v39  ;;  %221 = vst.msk [vmem:[%s467_s2 + $0x10] sm:$0xff] %vm190_vm2, %v217_v40 }
  0xb4 PF: > { %s13_s11 = sadd.s32 1, %s329_s11   ;;  %s468_s9 = smov %s325_s10 }
  0xb5   : > { %p10_p6 = scmp.ge.s32.totalorder %s13_s11, 4   ;;  %s469_s10 = smov %s471_s12 }
  0xb7   :  { %12 = sbr.rel (!%p10_p6) target bundleno = 2 (0x2), region = 62 }

// kernel: dcgan_generator_forward.29
= control target key start
LH: loop header
LB: loop body
LE: loop exit
PB: predicated region body
PF: predicated region fallthrough
CT: control target
= control target key end

     0   :  { %s447_s12 = smov 0   ;;  %s449_s13 = smov 0   ;;  %s512_s0 = inlined_call_operand.vmem [shape: f32[2,32,64], index: 0, kind: input, shape index: {}]   ;;  %s513_s1 = inlined_call_operand.vmem [shape: f32[32,1], index: 1, kind: input, shape index: {}]   ;;  %s514_s2 = inlined_call_operand.vmem [shape: f32[32,1], index: 2, kind: input, shape index: {}]   ;;  %s515_s3 = inlined_call_operand.vmem [shape: f32[2,32,64], index: 3, kind: output, shape index: {}]  }
   0x1   :  { %s451_s14 = smov 0  }
   0x2 LB: > { %s25_s15 = sadd.s32 1, %s420_s13  ;;  %p366_p0 = scmp.ge.s32.totalorder %s424_s14, 1  ;;  %s424_s14 = sphi %s451_s14, %s13_s14   ;;  %s420_s13 = sphi %s449_s13, %s517_s13   ;;  %s416_s12 = sphi %s447_s12, %s516_s12  }
   0x3   : > { %p27_p1 = scmp.ge.s32.totalorder %s25_s15, 2  ;;  %p156_p2 = scmp.lt.s32.totalorder %s424_s14, 3 }
   0x5   : > { %s519_s15 = smov (%p27_p1, %s25_s15), 0  ;;  %p157_p3 = pnand %p366_p0, %p156_p2 }
   0x6   : > { %v208_v0 = vld [vmem:[%s513_s1 + $0x10] sm:$0xff] (!%p157_p3)  ;;  %v206_v1 = vld [vmem:[%s513_s1] sm:$0xff] (!%p157_p3)  ;;  %v426_v2 = vmov (!%p157_p3), 0   ;;  %v209_v3 = vld [vmem:[%s513_s1 + $0x18] sm:$0xff] (!%p157_p3)  ;;  %p186_p4 = scmp.lt.s32.totalorder (!%p157_p3), %s416_s12, 1  ;;  %vm274_vm0 = vcmask (!%p157_p3), 523264  }
   0x7   : > { %160 = sbr.rel (%p157_p3) target bundleno = 154 (0x9a), region = 32  ;;  %401 = vset.pattern.permute.xlu1 (!%p157_p3), %v426_v2  ;;  %400 = vset.pattern.permute.xlu0 (!%p157_p3), %v426_v2  ;;  %v207_v4 = vld [vmem:[%s513_s1 + $0x8] sm:$0xff] (!%p157_p3)  ;;  %v234_v6 = vld [vmem:[%s514_s2] sm:$0xff] (!%p157_p3)  ;;  %v237_v7 = vld [vmem:[%s514_s2 + $0x18] sm:$0xff] (!%p157_p3) }
   0x8   : > { %222 = vperm.xlu1 (!%p157_p3), %401, %v208_v0   ;;  %212 = vperm.xlu0 (!%p157_p3), %400, %v206_v1   ;;  %v235_v5 = vld [vmem:[%s514_s2 + $0x8] sm:$0xff] (!%p157_p3)  ;;  %v236_v8 = vld [vmem:[%s514_s2 + $0x10] sm:$0xff] (!%p157_p3) }
   0xc   : > { %227 = vperm.xlu1 (!%p157_p3), %401, %v209_v3   ;;  %217 = vperm.xlu0 (!%p157_p3), %400, %v207_v4  }
   0xe   : > { %s521_s12 = smov (!%p186_p4, %s416_s12), 1 }
   0xf   : > { %s373_s5 = sshll.u32 %s521_s12, 5 }
  0x10   : > { %245 = vperm.xlu1 %401, %v235_v5   ;;  %240 = vperm.xlu0 %400, %v234_v6   ;;  %s193_s8 = scalar_lea.vmem %s512_s0, %s373_s5  ;;  %s201_s11 = scalar_lea.vmem %s515_s3, %s373_s5 }
  0x11   : > { %v202_v11 = vld [vmem:[%s193_s8] sm:$0xff]  ;;  %v203_v14 = vld [vmem:[%s193_s8 + $0x8] sm:$0xff]  ;;  %v204_v15 = vld [vmem:[%s193_s8 + $0x10] sm:$0xff] }
  0x12   : > { %v205_v17 = vld [vmem:[%s193_s8 + $0x18] sm:$0xff] }
  0x14   : > { %255 = vperm.xlu1 %401, %v237_v7   ;;  %250 = vperm.xlu0 %400, %v236_v8  }
  0x87   : > { %v223_v9 = vpop.permute.xlu1 %222  ;;  %v213_v10 = vpop.permute.xlu0 %212 }
  0x88   : > { %v230_v16 = vmul.f32 %v213_v10, %v202_v11  ;;  %v232_v23 = vmul.f32 %v223_v9, %v204_v15 }
  0x8b   : > { %v228_v12 = vpop.permute.xlu1 %227  ;;  %v218_v13 = vpop.permute.xlu0 %217 }
  0x8c   : > { %v231_v18 = vmul.f32 %v218_v13, %v203_v14  ;;  %v233_v24 = vmul.f32 %v228_v12, %v205_v17 }
  0x8f   : > { %v246_v19 = vpop.permute.xlu1 %245  ;;  %v241_v20 = vpop.permute.xlu0 %240 }
  0x90   : > { %v259_v21 = vadd.f32 %v246_v19, %v231_v18  ;;  %v258_v22 = vadd.f32 %v241_v20, %v230_v16 }
  0x92   : > { %vm263_vm1 = vcmp.ge.f32.partialorder %v259_v21, 0.0  ;;  %v267_v25 = vmul.f32 0.2, %v259_v21  ;;  %vm262_vm2 = vcmp.ge.f32.partialorder %v258_v22, 0.0  ;;  %v266_v26 = vmul.f32 0.2, %v258_v22 }
  0x93   : > { %v256_v27 = vpop.permute.xlu1 %255  ;;  %v251_v28 = vpop.permute.xlu0 %250 }
  0x94   : > { %v271_v29 = vsel %vm263_vm1, %v259_v21, %v267_v25  ;;  %v270_v30 = vsel %vm262_vm2, %v258_v22, %v266_v26  ;;  %v261_v31 = vadd.f32 %v256_v27, %v233_v24  ;;  %v260_v32 = vadd.f32 %v251_v28, %v232_v23 }
  0x95   : > { %276 = vst.msk [vmem:[%s201_s11 + $0x8] sm:$0xff] %vm274_vm0, %v271_v29  ;;  %275 = vst.msk [vmem:[%s201_s11] sm:$0xff] %vm274_vm0, %v270_v30 }
  0x96   : > { %vm265_vm3 = vcmp.ge.f32.partialorder %v261_v31, 0.0  ;;  %v269_v33 = vmul.f32 0.2, %v261_v31  ;;  %vm264_vm4 = vcmp.ge.f32.partialorder %v260_v32, 0.0  ;;  %v268_v34 = vmul.f32 0.2, %v260_v32 }
  0x98   : > { %v273_v35 = vsel %vm265_vm3, %v261_v31, %v269_v33  ;;  %v272_v36 = vsel %vm264_vm4, %v260_v32, %v268_v34 }
  0x99   : > { %278 = vst.msk [vmem:[%s201_s11 + $0x18] sm:$0xff] %vm274_vm0, %v273_v35  ;;  %277 = vst.msk [vmem:[%s201_s11 + $0x10] sm:$0xff] %vm274_vm0, %v272_v36 }
  0x9a PF: > { %s13_s14 = sadd.s32 1, %s424_s14   ;;  %s516_s12 = smov %s420_s13 }
  0x9b   : > { %p10_p5 = scmp.ge.s32.totalorder %s13_s14, 4   ;;  %s517_s13 = smov %s519_s15 }
  0x9d   :  { %12 = sbr.rel (!%p10_p5) target bundleno = 2 (0x2), region = 62 }

// kernel: dcgan_generator_forward.30
= control target key start
LH: loop header
LB: loop body
LE: loop exit
PB: predicated region body
PF: predicated region fallthrough
CT: control target
= control target key end

     0   :  { %s562_s12 = smov 0   ;;  %s564_s13 = smov 0   ;;  %s629_s0 = inlined_call_operand.vmem [shape: f32[2,128,64], index: 0, kind: input, shape index: {}]   ;;  %s630_s1 = inlined_call_operand.vmem [shape: f32[16,128], index: 1, kind: input, shape index: {}]   ;;  %s631_s2 = inlined_call_operand.vmem [shape: f32[16,1], index: 2, kind: input, shape index: {}]   ;;  %s632_s3 = inlined_call_operand.vmem [shape: f32[2,16,64], index: 3, kind: output, shape index: {}]  }
   0x1   :  { %s566_s14 = smov 0  }
   0x2 LB: > { %s25_s15 = sadd.s32 1, %s535_s13  ;;  %p397_p0 = scmp.ge.s32.totalorder %s539_s14, 1  ;;  %s539_s14 = sphi %s566_s14, %s13_s14   ;;  %s535_s13 = sphi %s564_s13, %s634_s13   ;;  %s531_s12 = sphi %s562_s12, %s633_s12  }
   0x3   : > { %p27_p1 = scmp.ge.s32.totalorder %s25_s15, 2  ;;  %p156_p2 = scmp.lt.s32.totalorder %s539_s14, 3 }
   0x5   : > { %s636_s15 = smov (%p27_p1, %s25_s15), 0  ;;  %p157_p3 = pnand %p397_p0, %p156_p2 }
   0x6   : > { %p186_p4 = scmp.lt.s32.totalorder (!%p157_p3), %s531_s12, 1  ;;  %v202_v0 = vld [vmem:[%s630_s1] sm:$0xff] (!%p157_p3)  ;;  %v541_v2 = vmov (!%p157_p3), 0   ;;  %v221_v3 = vld [vmem:[%s631_s2 + $0x8] sm:$0xff] (!%p157_p3)  ;;  %vm307_vm0 = vcmask (!%p157_p3), 523264  }
   0x7   : > { %160 = sbr.rel (%p157_p3) target bundleno = 268 (0x10c), region = 32  ;;  %v220_v1 = vld [vmem:[%s631_s2] sm:$0xff] (!%p157_p3)  ;;  %456 = vmatprep.mubr.f32.mxu0 (!%p157_p3), %v202_v0  ;;  %516 = vset.pattern.permute.xlu0 (!%p157_p3), %v541_v2  ;;  %v203_v28 = vld [vmem:[%s630_s1 + $0x8] sm:$0xff] (!%p157_p3) }
   0x8   : > { %224 = vperm.xlu0 (!%p157_p3), %516, %v220_v1  }
   0xc   : > { %229 = vperm.xlu0 (!%p157_p3), %516, %v221_v3  }
   0xe   : > { %s638_s12 = smov (!%p186_p4, %s531_s12), 1 }
   0xf   : > { %s404_s22 = sshll.u32 %s638_s12, 7  ;;  %s405_s28 = sshll.u32 %s638_s12, 4 }
  0x10   : > { %s595_s25 = scalar_lea.vmem %s629_s0, %s404_s22  ;;  %s201_s4 = scalar_lea.vmem %s632_s3, %s405_s28 }
  0x11   : > { %v204_v4 = vld [vmem:[%s595_s25] sm:$0xff]  ;;  %v205_v5 = vld [vmem:[%s595_s25 + $0x8] sm:$0xff]  ;;  %v206_v6 = vld [vmem:[%s595_s25 + $0x10] sm:$0xff] }
  0x12   : > { %v459_v7 = vpack.c.bf16 %v205_v5, %v204_v4  ;;  %v207_v8 = vld [vmem:[%s595_s25 + $0x18] sm:$0xff]  ;;  %v208_v10 = vld [vmem:[%s595_s25 + $0x20] sm:$0xff]  ;;  %v209_v11 = vld [vmem:[%s595_s25 + $0x28] sm:$0xff] }
  0x13   : > { %v463_v9 = vpack.c.bf16 %v207_v8, %v206_v6  ;;  %v467_v12 = vpack.c.bf16 %v209_v11, %v208_v10  ;;  %v210_v13 = vld [vmem:[%s595_s25 + $0x30] sm:$0xff]  ;;  %v211_v14 = vld [vmem:[%s595_s25 + $0x38] sm:$0xff]  ;;  %v212_v16 = vld [vmem:[%s595_s25 + $0x40] sm:$0xff] }
  0x14   : > { %460 = vmatprep.subr.bf16.mxu0 %v459_v7  ;;  %v471_v15 = vpack.c.bf16 %v211_v14, %v210_v13  ;;  %v213_v17 = vld [vmem:[%s595_s25 + $0x48] sm:$0xff]  ;;  %v214_v19 = vld [vmem:[%s595_s25 + $0x50] sm:$0xff]  ;;  %v215_v20 = vld [vmem:[%s595_s25 + $0x58] sm:$0xff] }
  0x15   : > { %462 = vmatpush3.bf16.msra.mxu0 %v459_v7  ;;  %v475_v18 = vpack.c.bf16 %v213_v17, %v212_v16  ;;  %v479_v21 = vpack.c.bf16 %v215_v20, %v214_v19  ;;  %v216_v22 = vld [vmem:[%s595_s25 + $0x60] sm:$0xff]  ;;  %v217_v23 = vld [vmem:[%s595_s25 + $0x68] sm:$0xff]  ;;  %v218_v25 = vld [vmem:[%s595_s25 + $0x70] sm:$0xff] }
  0x16   : > { %464 = vmatprep.subr.bf16.mxu0 %v463_v9  ;;  %v483_v24 = vpack.c.bf16 %v217_v23, %v216_v22  ;;  %v219_v26 = vld [vmem:[%s595_s25 + $0x78] sm:$0xff] }
  0x17   : > { %v487_v27 = vpack.c.bf16 %v219_v26, %v218_v25 }
  0x19   : > { %466 = vmatpush3.bf16.msra.mxu0 %v463_v9 }
  0x1a   : > { %468 = vmatprep.subr.bf16.mxu0 %v467_v12 }
  0x1d   : > { %470 = vmatpush3.bf16.msra.mxu0 %v467_v12 }
  0x1e   : > { %472 = vmatprep.subr.bf16.mxu0 %v471_v15 }
  0x21   : > { %474 = vmatpush3.bf16.msra.mxu0 %v471_v15 }
  0x22   : > { %476 = vmatprep.subr.bf16.mxu0 %v475_v18 }
  0x25   : > { %478 = vmatpush3.bf16.msra.mxu0 %v475_v18 }
  0x26   : > { %480 = vmatprep.subr.bf16.mxu0 %v479_v21 }
  0x29   : > { %482 = vmatpush3.bf16.msra.mxu0 %v479_v21 }
  0x2a   : > { %484 = vmatprep.subr.bf16.mxu0 %v483_v24 }
  0x2d   : > { %486 = vmatpush3.bf16.msra.mxu0 %v483_v24 }
  0x2e   : > { %488 = vmatprep.subr.bf16.mxu0 %v487_v27 }
  0x31   : > { %490 = vmatpush3.bf16.msra.mxu0 %v487_v27 }
  0x34   : > { %457 = vmatmul.mubr.f32.vlgmr.msra.gmra.mrb[0].mxu0 %v203_v28 }
  0x87   : > { %v225_v29 = vpop.permute.xlu0 %224 }
  0x8b   : > { %v230_v30 = vpop.permute.xlu0 %229 }
 0x107   : > { %v458_v31 = vpop.f32.mrb[0].mxu0 }
 0x108   : > { %v304_v32 = vadd.f32 %v458_v31, %v230_v30  ;;  %v298_v33 = vpop.f32.mrb[1].mxu0 }
 0x109   : > { %v299_v34 = vadd.f32 %v298_v33, %v225_v29 }
 0x10a   : > { %309 = vst.msk [vmem:[%s201_s4 + $0x8] sm:$0xff] %vm307_vm0, %v304_v32 }
 0x10b   : > { %308 = vst.msk [vmem:[%s201_s4] sm:$0xff] %vm307_vm0, %v299_v34 }
 0x10c PF: > { %s13_s14 = sadd.s32 1, %s539_s14   ;;  %s633_s12 = smov %s535_s13 }
 0x10d   : > { %p10_p5 = scmp.ge.s32.totalorder %s13_s14, 4   ;;  %s634_s13 = smov %s636_s15 }
 0x10f   :  { %12 = sbr.rel (!%p10_p5) target bundleno = 2 (0x2), region = 62 }

// kernel: dcgan_generator_forward.34
= control target key start
LH: loop header
LB: loop body
LE: loop exit
PB: predicated region body
PF: predicated region fallthrough
CT: control target
= control target key end

     0   :  { %s323_s9 = smov 0   ;;  %s325_s10 = smov 0   ;;  %s389_s0 = inlined_call_operand.vmem [shape: f32[2,16,256], index: 0, kind: input, shape index: {}]   ;;  %s390_s1 = inlined_call_operand.vmem [shape: f32[16,1], index: 1, kind: output, shape index: {0}]   ;;  %s391_s2 = inlined_call_operand.vmem [shape: f32[16,1], index: 2, kind: output, shape index: {1}]  }
   0x1   :  { %s327_s11 = smov 0  }
   0x2 LB: > { %s25_s12 = sadd.s32 1, %s301_s10  ;;  %p250_p0 = scmp.ge.s32.totalorder %s305_s11, 1  ;;  %s305_s11 = sphi %s327_s11, %s13_s11   ;;  %s301_s10 = sphi %s325_s10, %s393_s10   ;;  %s297_s9 = sphi %s323_s9, %s392_s9  }
   0x3   : > { %p27_p1 = scmp.ge.s32.totalorder %s25_s12, 2  ;;  %p124_p2 = scmp.lt.s32.totalorder %s305_s11, 3 }
   0x5   : > { %s395_s12 = smov (%p27_p1, %s25_s12), 0  ;;  %p125_p3 = pnand %p250_p0, %p124_p2 }
   0x6   : > { %p146_p4 = scmp.lt.s32.totalorder (!%p125_p3), %s297_s9, 1  ;;  %p155_p5 = scmp.eq.s32.totalorder (!%p125_p3), %s297_s9, 0 }
   0x7   : > { %128 = sbr.rel (%p125_p3) target bundleno = 175 (0xaf), region = 24 }
   0xe   : > { %s397_s9 = smov (!%p146_p4, %s297_s9), 1  ;;  %160 = sbr.rel (!%p155_p5) target bundleno = 21 (0x15), region = 28 }
   0xf   : > { %s256_s13 = sshll.u32 %s397_s9, 5  ;;  %vm161_vm0 = vcmask (%p155_p5), 7168   ;;  %v307_v0 = vmov (%p155_p5), 0.0  }
  0x10   : > { %s153_s16 = scalar_lea.vmem %s389_s0, %s256_s13  ;;  %162 = vst.msk [vmem:[%s390_s1] sm:$0xff] (%p155_p5), %vm161_vm0, %v307_v0  ;;  %163 = vst.msk [vmem:[%s390_s1 + $0x8] sm:$0xff] (%p155_p5), %vm161_vm0, %v307_v0 }
  0x11   : > { %164 = vst.msk [vmem:[%s391_s2] sm:$0xff] (%p155_p5), %vm161_vm0, %v307_v0  ;;  %165 = vst.msk [vmem:[%s391_s2 + $0x8] sm:$0xff] (%p155_p5), %vm161_vm0, %v307_v0 }
  0x15 PF: > { %v166_v1 = vld [vmem:[%s153_s16] sm:$0xff]  ;;  %v167_v2 = vld [vmem:[%s153_s16 + $0x8] sm:$0xff]  ;;  %v168_v3 = vld [vmem:[%s153_s16 + $0x10] sm:$0xff]  ;;  %vm180_vm1 = vcmask 7168  }
  0x16   : > { %v185_v4 = vmul.f32 %v166_v1, %v166_v1  ;;  %v186_v5 = vmul.f32 %v167_v2, %v167_v2  ;;  %v172_v6 = vadd.f32 %v167_v2, %v166_v1  ;;  %v169_v7 = vld [vmem:[%s153_s16 + $0x18] sm:$0xff]  ;;  %v187_v8 = vmul.f32 %v168_v3, %v168_v3 }
  0x17   : > { %v188_v9 = vmul.f32 %v169_v7, %v169_v7  ;;  %v175_v11 = vadd.f32 %v169_v7, %v168_v3  ;;  %v170_v13 = vld [vmem:[%s390_s1] sm:$0xff]  ;;  %v171_v18 = vld [vmem:[%s390_s1 + $0x8] sm:$0xff] }
  0x18   : > { %v189_v10 = vadd.f32 %v186_v5, %v185_v4  ;;  %173 = vadd.xlane.f32.xlu0 %v172_v6  ;;  %v183_v14 = vld [vmem:[%s391_s2] sm:$0xff]  ;;  %v184_v20 = vld [vmem:[%s391_s2 + $0x8] sm:$0xff] }
  0x19   : > { %v192_v12 = vadd.f32 %v188_v9, %v187_v8 }
  0x1a   : > { %190 = vadd.xlane.f32.xlu1 %v189_v10 }
  0x1c   : > { %176 = vadd.xlane.f32.xlu0 %v175_v11 }
  0x1e   : > { %193 = vadd.xlane.f32.xlu1 %v192_v12 }
  0xa5   : > { %v174_v15 = vpop.xlane.xlu0 %173 }
  0xa6   : > { %v178_v16 = vadd.f32 %v174_v15, %v170_v13 }
  0xa7   : > { %v191_v17 = vpop.xlane.xlu1 %190 }
  0xa8   : > { %v195_v19 = vadd.f32 %v191_v17, %v183_v14  ;;  %181 = vst.msk [vmem:[%s390_s1] sm:$0xff] %vm180_vm1, %v178_v16 }
  0xa9   : > { %v177_v21 = vpop.xlane.xlu0 %176 }
  0xaa   : > { %197 = vst.msk [vmem:[%s391_s2] sm:$0xff] %vm180_vm1, %v195_v19  ;;  %v179_v22 = vadd.f32 %v177_v21, %v171_v18 }
  0xab   : > { %v194_v23 = vpop.xlane.xlu1 %193 }
  0xac   : > { %v196_v24 = vadd.f32 %v194_v23, %v184_v20  ;;  %182 = vst.msk [vmem:[%s390_s1 + $0x8] sm:$0xff] %vm180_vm1, %v179_v22 }
  0xae   : > { %198 = vst.msk [vmem:[%s391_s2 + $0x8] sm:$0xff] %vm180_vm1, %v196_v24 }
  0xaf PF: > { %s13_s11 = sadd.s32 1, %s305_s11   ;;  %s392_s9 = smov %s301_s10 }
  0xb0   : > { %p10_p6 = scmp.ge.s32.totalorder %s13_s11, 4   ;;  %s393_s10 = smov %s395_s12 }
  0xb2   :  { %12 = sbr.rel (!%p10_p6) target bundleno = 2 (0x2), region = 62 }

// kernel: dcgan_generator_forward.35
= control target key start
LH: loop header
LB: loop body
LE: loop exit
PB: predicated region body
PF: predicated region fallthrough
CT: control target
= control target key end

     0   :  { %s434_s12 = smov 0   ;;  %s436_s13 = smov 0   ;;  %s479_s0 = inlined_call_operand.vmem [shape: f32[2,16,256], index: 0, kind: input, shape index: {}]   ;;  %s480_s1 = inlined_call_operand.vmem [shape: f32[16,1], index: 1, kind: input, shape index: {}]   ;;  %s481_s2 = inlined_call_operand.vmem [shape: f32[16,1], index: 2, kind: input, shape index: {}]   ;;  %s482_s3 = inlined_call_operand.vmem [shape: f32[2,16,256], index: 3, kind: output, shape index: {}]  }
   0x1   :  { %s438_s14 = smov 0  }
   0x2 LB: > { %s25_s15 = sadd.s32 1, %s407_s13  ;;  %p353_p0 = scmp.ge.s32.totalorder %s411_s14, 1  ;;  %s411_s14 = sphi %s438_s14, %s13_s14   ;;  %s407_s13 = sphi %s436_s13, %s484_s13   ;;  %s403_s12 = sphi %s434_s12, %s483_s12  }
   0x3   : > { %p27_p1 = scmp.ge.s32.totalorder %s25_s15, 2  ;;  %p158_p2 = scmp.lt.s32.totalorder %s411_s14, 3 }
   0x5   : > { %s486_s15 = smov (%p27_p1, %s25_s15), 0  ;;  %p159_p3 = pnand %p353_p0, %p158_p2 }
   0x6   : > { %v230_v0 = vld [vmem:[%s481_s2] sm:$0xff] (!%p159_p3)  ;;  %v413_v2 = vmov (!%p159_p3), 0   ;;  %v231_v3 = vld [vmem:[%s481_s2 + $0x8] sm:$0xff] (!%p159_p3)  ;;  %p191_p4 = scmp.lt.s32.totalorder (!%p159_p3), %s403_s12, 1 }
   0x7   : > { %162 = sbr.rel (%p159_p3) target bundleno = 149 (0x95), region = 32  ;;  %v214_v1 = vld [vmem:[%s480_s1] sm:$0xff] (!%p159_p3)  ;;  %388 = vset.pattern.permute.xlu1 (!%p159_p3), %v413_v2  ;;  %387 = vset.pattern.permute.xlu0 (!%p159_p3), %v413_v2  ;;  %v215_v4 = vld [vmem:[%s480_s1 + $0x8] sm:$0xff] (!%p159_p3) }
   0x8   : > { %234 = vperm.xlu1 (!%p159_p3), %388, %v230_v0   ;;  %218 = vperm.xlu0 (!%p159_p3), %387, %v214_v1  }
   0xc   : > { %239 = vperm.xlu1 (!%p159_p3), %388, %v231_v3   ;;  %223 = vperm.xlu0 (!%p159_p3), %387, %v215_v4  }
   0xe   : > { %s488_s12 = smov (!%p191_p4, %s403_s12), 1 }
   0xf   : > { %s360_s24 = sshll.u32 %s488_s12, 5 }
  0x10   : > { %s198_s27 = scalar_lea.vmem %s479_s0, %s360_s24  ;;  %s208_s30 = scalar_lea.vmem %s482_s3, %s360_s24 }
  0x11   : > { %v210_v5 = vld [vmem:[%s198_s27] sm:$0xff]  ;;  %v211_v6 = vld [vmem:[%s198_s27 + $0x8] sm:$0xff]  ;;  %v212_v13 = vld [vmem:[%s198_s27 + $0x10] sm:$0xff] }
  0x12   : > { %v213_v14 = vld [vmem:[%s198_s27 + $0x18] sm:$0xff] }
  0x87   : > { %v219_v7 = vpop.permute.xlu0 %218  ;;  %v235_v8 = vpop.permute.xlu1 %234 }
  0x88   : > { %v226_v9 = vmul.f32 %v219_v7, %v210_v5  ;;  %v227_v10 = vmul.f32 %v219_v7, %v211_v6 }
  0x8a   : > { %v242_v11 = vadd.f32 %v235_v8, %v226_v9  ;;  %v243_v12 = vadd.f32 %v235_v8, %v227_v10 }
  0x8b   : > { %v224_v15 = vpop.permute.xlu0 %223  ;;  %v240_v22 = vpop.permute.xlu1 %239 }
  0x8c   : > { %vm246_vm0 = vcmp.ge.f32.partialorder %v242_v11, 0.0  ;;  %vm247_vm1 = vcmp.ge.f32.partialorder %v243_v12, 0.0  ;;  %v250_v16 = vmul.f32 0.2, %v242_v11  ;;  %v251_v17 = vmul.f32 0.2, %v243_v12 }
  0x8d   : > { %v228_v18 = vmul.f32 %v224_v15, %v212_v13  ;;  %v229_v19 = vmul.f32 %v224_v15, %v213_v14 }
  0x8e   : > { %v254_v20 = vsel %vm246_vm0, %v242_v11, %v250_v16  ;;  %v255_v21 = vsel %vm247_vm1, %v243_v12, %v251_v17 }
  0x8f   : > { %258 = vst [vmem:[%s208_s30] sm:$0xff] %v254_v20  ;;  %259 = vst [vmem:[%s208_s30 + $0x8] sm:$0xff] %v255_v21  ;;  %v244_v23 = vadd.f32 %v240_v22, %v228_v18  ;;  %v245_v24 = vadd.f32 %v240_v22, %v229_v19 }
  0x91   : > { %vm248_vm2 = vcmp.ge.f32.partialorder %v244_v23, 0.0  ;;  %vm249_vm3 = vcmp.ge.f32.partialorder %v245_v24, 0.0  ;;  %v252_v25 = vmul.f32 0.2, %v244_v23  ;;  %v253_v26 = vmul.f32 0.2, %v245_v24 }
  0x93   : > { %v256_v27 = vsel %vm248_vm2, %v244_v23, %v252_v25  ;;  %v257_v28 = vsel %vm249_vm3, %v245_v24, %v253_v26 }
  0x94   : > { %260 = vst [vmem:[%s208_s30 + $0x10] sm:$0xff] %v256_v27  ;;  %261 = vst [vmem:[%s208_s30 + $0x18] sm:$0xff] %v257_v28 }
  0x95 PF: > { %s13_s14 = sadd.s32 1, %s411_s14   ;;  %s483_s12 = smov %s407_s13 }
  0x96   : > { %p10_p5 = scmp.ge.s32.totalorder %s13_s14, 4   ;;  %s484_s13 = smov %s486_s15 }
  0x98   :  { %12 = sbr.rel (!%p10_p5) target bundleno = 2 (0x2), region = 62 }

// kernel: dcgan_generator_forward.36
= control target key start
LH: loop header
LB: loop body
LE: loop exit
PB: predicated region body
PF: predicated region fallthrough
CT: control target
= control target key end

     0   :  { %s500_s12 = smov 0   ;;  %s502_s13 = smov 0   ;;  %s543_s0 = inlined_call_operand.vmem [shape: f32[2,64,256], index: 0, kind: input, shape index: {}]   ;;  %s544_s1 = inlined_call_operand.vmem [shape: f32[8,64], index: 1, kind: input, shape index: {}]   ;;  %s545_s2 = inlined_call_operand.vmem [shape: f32[8,1], index: 2, kind: input, shape index: {}]   ;;  %s546_s3 = inlined_call_operand.vmem [shape: f32[2,8,256], index: 3, kind: output, shape index: {}]  }
   0x1   :  { %s504_s14 = smov 0  }
   0x2 LB: > { %s25_s15 = sadd.s32 1, %s472_s13  ;;  %p401_p0 = scmp.ge.s32.totalorder %s476_s14, 1  ;;  %s476_s14 = sphi %s504_s14, %s13_s14   ;;  %s472_s13 = sphi %s502_s13, %s548_s13   ;;  %s468_s12 = sphi %s500_s12, %s547_s12  }
   0x3   : > { %p27_p1 = scmp.ge.s32.totalorder %s25_s15, 2  ;;  %p158_p2 = scmp.lt.s32.totalorder %s476_s14, 3 }
   0x5   : > { %s550_s15 = smov (%p27_p1, %s25_s15), 0  ;;  %p159_p3 = pnand %p401_p0, %p158_p2 }
   0x6   : > { %p191_p4 = scmp.lt.s32.totalorder (!%p159_p3), %s468_s12, 1  ;;  %v227_v0 = vld [vmem:[%s545_s2] sm:$0xff] (!%p159_p3)  ;;  %v478_v1 = vmov (!%p159_p3), 0.0   ;;  %v479_v2 = vmov (!%p159_p3), 0   ;;  %vm233_vm0 = vcmask (!%p159_p3), 523264  }
   0x7   : > { %162 = sbr.rel (%p159_p3) target bundleno = 252 (0xfc), region = 32  ;;  %301 = vmatprep.mubr.f32.mxu0 (!%p159_p3), %v478_v1  ;;  %453 = vset.pattern.permute.xlu0 (!%p159_p3), %v479_v2  ;;  %v210_v27 = vld [vmem:[%s544_s1] sm:$0xff] (!%p159_p3) }
   0x8   : > { %230 = vperm.xlu0 (!%p159_p3), %453, %v227_v0  }
   0xe   : > { %s552_s12 = smov (!%p191_p4, %s468_s12), 1 }
   0xf   : > { %s409_s18 = sshll.u32 %s552_s12, 7  ;;  %s410_s24 = sshll.u32 %s552_s12, 4 }
  0x10   : > { %s198_s21 = scalar_lea.vmem %s543_s0, %s409_s18  ;;  %s208_s27 = scalar_lea.vmem %s546_s3, %s410_s24 }
  0x11   : > { %v212_v3 = vld [vmem:[%s198_s21 + $0x8] sm:$0xff]  ;;  %v214_v4 = vld [vmem:[%s198_s21 + $0x18] sm:$0xff]  ;;  %v211_v5 = vld [vmem:[%s198_s21] sm:$0xff] }
  0x12   : > { %v411_v6 = vpack.c.bf16 %v214_v4, %v212_v3  ;;  %v213_v7 = vld [vmem:[%s198_s21 + $0x10] sm:$0xff]  ;;  %v216_v8 = vld [vmem:[%s198_s21 + $0x28] sm:$0xff]  ;;  %v218_v9 = vld [vmem:[%s198_s21 + $0x38] sm:$0xff] }
  0x13   : > { %v413_v10 = vpack.c.bf16 %v213_v7, %v211_v5  ;;  %v415_v11 = vpack.c.bf16 %v218_v9, %v216_v8  ;;  %v215_v12 = vld [vmem:[%s198_s21 + $0x20] sm:$0xff]  ;;  %v217_v13 = vld [vmem:[%s198_s21 + $0x30] sm:$0xff]  ;;  %v220_v14 = vld [vmem:[%s198_s21 + $0x48] sm:$0xff] }
  0x14   : > { %412 = vmatprep.subr.bf16.mxu0 %v411_v6  ;;  %v222_v15 = vld [vmem:[%s198_s21 + $0x58] sm:$0xff]  ;;  %v417_v16 = vpack.c.bf16 %v217_v13, %v215_v12  ;;  %v219_v18 = vld [vmem:[%s198_s21 + $0x40] sm:$0xff]  ;;  %v221_v19 = vld [vmem:[%s198_s21 + $0x50] sm:$0xff] }
  0x15   : > { %414 = vmatpush1.bf16.msra.mxu0 %v413_v10  ;;  %v419_v17 = vpack.c.bf16 %v222_v15, %v220_v14  ;;  %v224_v20 = vld [vmem:[%s198_s21 + $0x68] sm:$0xff]  ;;  %v226_v21 = vld [vmem:[%s198_s21 + $0x78] sm:$0xff]  ;;  %v421_v22 = vpack.c.bf16 %v221_v19, %v219_v18  ;;  %v223_v24 = vld [vmem:[%s198_s21 + $0x60] sm:$0xff] }
  0x16   : > { %416 = vmatprep.subr.bf16.mxu0 %v415_v11  ;;  %v423_v23 = vpack.c.bf16 %v226_v21, %v224_v20  ;;  %v225_v25 = vld [vmem:[%s198_s21 + $0x70] sm:$0xff] }
  0x17   : > { %v425_v26 = vpack.c.bf16 %v225_v25, %v223_v24 }
  0x19   : > { %418 = vmatpush1.bf16.msra.mxu0 %v417_v16 }
  0x1a   : > { %420 = vmatprep.subr.bf16.mxu0 %v419_v17 }
  0x1d   : > { %422 = vmatpush1.bf16.msra.mxu0 %v421_v22 }
  0x1e   : > { %424 = vmatprep.subr.bf16.mxu0 %v423_v23 }
  0x21   : > { %426 = vmatpush1.bf16.msra.mxu0 %v425_v26 }
  0x24   : > { %406 = vmatmul.mubr.msk.f32.vlgmr.msra.gmra.mrb[0].mxu0 %vm233_vm0, %v210_v27 }
  0x87   : > { %v231_v28 = vpop.permute.xlu0 %230 }
  0xf7   : > { %v303_v29 = vpop.f32.mrb[0].mxu0 }
  0xf8   : > { %v304_v30 = vadd.f32 %v303_v29, %v231_v28  ;;  %v305_v31 = vpop.f32.mrb[1].mxu0 }
  0xf9   : > { %v306_v32 = vadd.f32 %v305_v31, %v231_v28 }
  0xfa   : > { %308 = vst [vmem:[%s208_s27] sm:$0xff] %v304_v30 }
  0xfb   : > { %309 = vst [vmem:[%s208_s27 + $0x8] sm:$0xff] %v306_v32 }
  0xfc PF: > { %s13_s14 = sadd.s32 1, %s476_s14   ;;  %s547_s12 = smov %s472_s13 }
  0xfd   : > { %p10_p5 = scmp.ge.s32.totalorder %s13_s14, 4   ;;  %s548_s13 = smov %s550_s15 }
  0xff   :  { %12 = sbr.rel (!%p10_p5) target bundleno = 2 (0x2), region = 62 }

// kernel: dcgan_generator_forward.40
= control target key start
LH: loop header
LB: loop body
LE: loop exit
PB: predicated region body
PF: predicated region fallthrough
CT: control target
= control target key end

     0   :  { %s329_s9 = smov 0   ;;  %s331_s10 = smov 0   ;;  %s377_s0 = inlined_call_operand.vmem [shape: f32[2,8,1024], index: 0, kind: input, shape index: {}]   ;;  %s378_s1 = inlined_call_operand.vmem [shape: f32[8,1], index: 1, kind: output, shape index: {0}]   ;;  %s379_s2 = inlined_call_operand.vmem [shape: f32[8,1], index: 2, kind: output, shape index: {1}]  }
   0x1   :  { %s333_s11 = smov 0  }
   0x2 LB: > { %s25_s12 = sadd.s32 1, %s307_s10  ;;  %p256_p0 = scmp.ge.s32.totalorder %s311_s11, 1  ;;  %s311_s11 = sphi %s333_s11, %s13_s11   ;;  %s307_s10 = sphi %s331_s10, %s381_s10   ;;  %s303_s9 = sphi %s329_s9, %s380_s9  }
   0x3   : > { %p27_p1 = scmp.ge.s32.totalorder %s25_s12, 2  ;;  %p124_p2 = scmp.lt.s32.totalorder %s311_s11, 3 }
   0x5   : > { %s383_s12 = smov (%p27_p1, %s25_s12), 0  ;;  %p125_p3 = pnand %p256_p0, %p124_p2 }
   0x6   : > { %p146_p4 = scmp.lt.s32.totalorder (!%p125_p3), %s303_s9, 1  ;;  %p155_p5 = scmp.eq.s32.totalorder (!%p125_p3), %s303_s9, 0 }
   0x7   : > { %128 = sbr.rel (%p125_p3) target bundleno = 185 (0xb9), region = 24 }
   0xe   : > { %s385_s9 = smov (!%p146_p4, %s303_s9), 1  ;;  %160 = sbr.rel (!%p155_p5) target bundleno = 21 (0x15), region = 28 }
   0xf   : > { %s262_s13 = sshll.u32 %s385_s9, 6  ;;  %vm161_vm0 = vcmask (%p155_p5), 7168   ;;  %v313_v0 = vmov (%p155_p5), 0.0  }
  0x10   : > { %s153_s16 = scalar_lea.vmem %s377_s0, %s262_s13  ;;  %162 = vst.msk [vmem:[%s378_s1] sm:$0xff] (%p155_p5), %vm161_vm0, %v313_v0  ;;  %163 = vst.msk [vmem:[%s379_s2] sm:$0xff] (%p155_p5), %vm161_vm0, %v313_v0 }
  0x15 PF: > { %v164_v1 = vld [vmem:[%s153_s16] sm:$0xff]  ;;  %v165_v2 = vld [vmem:[%s153_s16 + $0x8] sm:$0xff]  ;;  %v166_v3 = vld [vmem:[%s153_s16 + $0x10] sm:$0xff]  ;;  %vm183_vm1 = vcmask 7168  }
  0x16   : > { %v173_v4 = vadd.f32 %v165_v2, %v164_v1  ;;  %v186_v5 = vmul.f32 %v164_v1, %v164_v1  ;;  %v187_v6 = vmul.f32 %v165_v2, %v165_v2  ;;  %v188_v7 = vmul.f32 %v166_v3, %v166_v3  ;;  %v167_v8 = vld [vmem:[%s153_s16 + $0x18] sm:$0xff]  ;;  %v168_v12 = vld [vmem:[%s153_s16 + $0x20] sm:$0xff]  ;;  %v169_v16 = vld [vmem:[%s153_s16 + $0x28] sm:$0xff] }
  0x17   : > { %v189_v10 = vmul.f32 %v167_v8, %v167_v8  ;;  %v190_v14 = vmul.f32 %v168_v12, %v168_v12  ;;  %v191_v18 = vmul.f32 %v169_v16, %v169_v16  ;;  %v170_v20 = vld [vmem:[%s153_s16 + $0x30] sm:$0xff]  ;;  %v171_v24 = vld [vmem:[%s153_s16 + $0x38] sm:$0xff]  ;;  %v172_v31 = vld [vmem:[%s378_s1] sm:$0xff] }
  0x18   : > { %v174_v9 = vadd.f32 %v173_v4, %v166_v3  ;;  %v194_v11 = vadd.f32 %v187_v6, %v186_v5  ;;  %v192_v22 = vmul.f32 %v170_v20, %v170_v20  ;;  %v193_v26 = vmul.f32 %v171_v24, %v171_v24  ;;  %v185_v34 = vld [vmem:[%s379_s2] sm:$0xff] }
  0x1a   : > { %v175_v13 = vadd.f32 %v174_v9, %v167_v8  ;;  %v195_v15 = vadd.f32 %v194_v11, %v188_v7 }
  0x1c   : > { %v176_v17 = vadd.f32 %v175_v13, %v168_v12  ;;  %v196_v19 = vadd.f32 %v195_v15, %v189_v10 }
  0x1e   : > { %v177_v21 = vadd.f32 %v176_v17, %v169_v16  ;;  %v197_v23 = vadd.f32 %v196_v19, %v190_v14 }
  0x20   : > { %v178_v25 = vadd.f32 %v177_v21, %v170_v20  ;;  %v198_v27 = vadd.f32 %v197_v23, %v191_v18 }
  0x22   : > { %v179_v28 = vadd.f32 %v178_v25, %v171_v24  ;;  %v199_v29 = vadd.f32 %v198_v27, %v192_v22 }
  0x24   : > { %180 = vadd.xlane.f32.xlu0 %v179_v28  ;;  %v200_v30 = vadd.f32 %v199_v29, %v193_v26 }
  0x28   : > { %201 = vadd.xlane.f32.xlu0 %v200_v30 }
  0xb1   : > { %v181_v32 = vpop.xlane.xlu0 %180 }
  0xb2   : > { %v182_v33 = vadd.f32 %v181_v32, %v172_v31 }
  0xb4   : > { %184 = vst.msk [vmem:[%s378_s1] sm:$0xff] %vm183_vm1, %v182_v33 }
  0xb5   : > { %v202_v35 = vpop.xlane.xlu0 %201 }
  0xb6   : > { %v203_v36 = vadd.f32 %v202_v35, %v185_v34 }
  0xb8   : > { %204 = vst.msk [vmem:[%s379_s2] sm:$0xff] %vm183_vm1, %v203_v36 }
  0xb9 PF: > { %s13_s11 = sadd.s32 1, %s311_s11   ;;  %s380_s9 = smov %s307_s10 }
  0xba   : > { %p10_p6 = scmp.ge.s32.totalorder %s13_s11, 4   ;;  %s381_s10 = smov %s383_s12 }
  0xbc   :  { %12 = sbr.rel (!%p10_p6) target bundleno = 2 (0x2), region = 62 }

// kernel: dcgan_generator_forward.41
= control target key start
LH: loop header
LB: loop body
LE: loop exit
PB: predicated region body
PF: predicated region fallthrough
CT: control target
= control target key end

     0   :  { %s449_s12 = smov 0   ;;  %s451_s13 = smov 0   ;;  %s503_s0 = inlined_call_operand.vmem [shape: f32[2,8,1024], index: 0, kind: input, shape index: {}]   ;;  %s504_s1 = inlined_call_operand.vmem [shape: f32[8,1], index: 1, kind: input, shape index: {}]   ;;  %s505_s2 = inlined_call_operand.vmem [shape: f32[8,1], index: 2, kind: input, shape index: {}]   ;;  %s506_s3 = inlined_call_operand.vmem [shape: f32[2,8,1024], index: 3, kind: output, shape index: {}]  }
   0x1   :  { %s453_s14 = smov 0  }
   0x2 LB: > { %s25_s15 = sadd.s32 1, %s422_s13  ;;  %p369_p0 = scmp.ge.s32.totalorder %s426_s14, 1  ;;  %s426_s14 = sphi %s453_s14, %s13_s14   ;;  %s422_s13 = sphi %s451_s13, %s508_s13   ;;  %s418_s12 = sphi %s449_s12, %s507_s12  }
   0x3   : > { %p27_p1 = scmp.ge.s32.totalorder %s25_s15, 2  ;;  %p158_p2 = scmp.lt.s32.totalorder %s426_s14, 3 }
   0x5   : > { %s510_s15 = smov (%p27_p1, %s25_s15), 0  ;;  %p159_p3 = pnand %p369_p0, %p158_p2 }
   0x6   : > { %v218_v0 = vld [vmem:[%s504_s1] sm:$0xff] (!%p159_p3)  ;;  %v428_v1 = vmov (!%p159_p3), 0   ;;  %p191_p4 = scmp.lt.s32.totalorder (!%p159_p3), %s418_s12, 1 }
   0x7   : > { %162 = sbr.rel (%p159_p3) target bundleno = 152 (0x98), region = 32  ;;  %403 = vset.pattern.permute.xlu0 (!%p159_p3), %v428_v1  ;;  %v232_v2 = vld [vmem:[%s505_s2] sm:$0xff] (!%p159_p3) }
   0x8   : > { %221 = vperm.xlu0 (!%p159_p3), %403, %v218_v0  }
   0xc   : > { %235 = vperm.xlu0 (!%p159_p3), %403, %v232_v2  }
   0xe   : > { %s512_s12 = smov (!%p191_p4, %s418_s12), 1 }
   0xf   : > { %s376_s20 = sshll.u32 %s512_s12, 6 }
  0x10   : > { %s198_s23 = scalar_lea.vmem %s503_s0, %s376_s20  ;;  %s208_s26 = scalar_lea.vmem %s506_s3, %s376_s20 }
  0x11   : > { %v210_v3 = vld [vmem:[%s198_s23] sm:$0xff]  ;;  %v211_v4 = vld [vmem:[%s198_s23 + $0x8] sm:$0xff]  ;;  %v212_v6 = vld [vmem:[%s198_s23 + $0x10] sm:$0xff] }
  0x12   : > { %v213_v7 = vld [vmem:[%s198_s23 + $0x18] sm:$0xff]  ;;  %v214_v8 = vld [vmem:[%s198_s23 + $0x20] sm:$0xff]  ;;  %v215_v9 = vld [vmem:[%s198_s23 + $0x28] sm:$0xff] }
  0x13   : > { %v216_v10 = vld [vmem:[%s198_s23 + $0x30] sm:$0xff]  ;;  %v217_v11 = vld [vmem:[%s198_s23 + $0x38] sm:$0xff] }
  0x87   : > { %v222_v5 = vpop.permute.xlu0 %221 }
  0x88   : > { %v224_v12 = vmul.f32 %v222_v5, %v210_v3  ;;  %v225_v13 = vmul.f32 %v222_v5, %v211_v4  ;;  %v226_v14 = vmul.f32 %v222_v5, %v212_v6  ;;  %v227_v15 = vmul.f32 %v222_v5, %v213_v7 }
  0x89   : > { %v228_v17 = vmul.f32 %v222_v5, %v214_v8  ;;  %v229_v18 = vmul.f32 %v222_v5, %v215_v9  ;;  %v230_v19 = vmul.f32 %v222_v5, %v216_v10  ;;  %v231_v20 = vmul.f32 %v222_v5, %v217_v11 }
  0x8b   : > { %v236_v16 = vpop.permute.xlu0 %235 }
  0x8c   : > { %v238_v21 = vadd.f32 %v236_v16, %v224_v12  ;;  %v239_v22 = vadd.f32 %v236_v16, %v225_v13  ;;  %v240_v23 = vadd.f32 %v236_v16, %v226_v14  ;;  %v241_v24 = vadd.f32 %v236_v16, %v227_v15 }
  0x8d   : > { %v242_v25 = vadd.f32 %v236_v16, %v228_v17  ;;  %v243_v26 = vadd.f32 %v236_v16, %v229_v18  ;;  %v244_v27 = vadd.f32 %v236_v16, %v230_v19  ;;  %v245_v28 = vadd.f32 %v236_v16, %v231_v20 }
  0x8e   : > { %vm246_vm0 = vcmp.ge.f32.partialorder %v238_v21, 0.0  ;;  %vm247_vm1 = vcmp.ge.f32.partialorder %v239_v22, 0.0  ;;  %vm248_vm2 = vcmp.ge.f32.partialorder %v240_v23, 0.0  ;;  %vm249_vm3 = vcmp.ge.f32.partialorder %v241_v24, 0.0 }
  0x8f   : > { %vm250_vm4 = vcmp.ge.f32.partialorder %v242_v25, 0.0  ;;  %vm251_vm5 = vcmp.ge.f32.partialorder %v243_v26, 0.0  ;;  %vm252_vm6 = vcmp.ge.f32.partialorder %v244_v27, 0.0  ;;  %vm253_vm7 = vcmp.ge.f32.partialorder %v245_v28, 0.0 }
  0x90   : > { %v254_v29 = vmul.f32 0.2, %v238_v21  ;;  %v255_v30 = vmul.f32 0.2, %v239_v22  ;;  %v256_v31 = vmul.f32 0.2, %v240_v23 }
  0x91   : > { %v257_v32 = vmul.f32 0.2, %v241_v24  ;;  %v258_v33 = vmul.f32 0.2, %v242_v25  ;;  %v259_v34 = vmul.f32 0.2, %v243_v26 }
  0x92   : > { %v260_v35 = vmul.f32 0.2, %v244_v27  ;;  %v261_v36 = vmul.f32 0.2, %v245_v28  ;;  %v262_v37 = vsel %vm246_vm0, %v238_v21, %v254_v29  ;;  %v263_v38 = vsel %vm247_vm1, %v239_v22, %v255_v30 }
  0x93   : > { %v264_v39 = vsel %vm248_vm2, %v240_v23, %v256_v31  ;;  %v265_v40 = vsel %vm249_vm3, %v241_v24, %v257_v32  ;;  %v266_v41 = vsel %vm250_vm4, %v242_v25, %v258_v33  ;;  %v267_v42 = vsel %vm251_vm5, %v243_v26, %v259_v34  ;;  %270 = vst [vmem:[%s208_s26] sm:$0xff] %v262_v37 }
  0x94   : > { %271 = vst [vmem:[%s208_s26 + $0x8] sm:$0xff] %v263_v38  ;;  %v268_v43 = vsel %vm252_vm6, %v244_v27, %v260_v35  ;;  %v269_v44 = vsel %vm253_vm7, %v245_v28, %v261_v36  ;;  %272 = vst [vmem:[%s208_s26 + $0x10] sm:$0xff] %v264_v39 }
  0x95   : > { %273 = vst [vmem:[%s208_s26 + $0x18] sm:$0xff] %v265_v40  ;;  %274 = vst [vmem:[%s208_s26 + $0x20] sm:$0xff] %v266_v41 }
  0x96   : > { %275 = vst [vmem:[%s208_s26 + $0x28] sm:$0xff] %v267_v42  ;;  %276 = vst [vmem:[%s208_s26 + $0x30] sm:$0xff] %v268_v43 }
  0x97   : > { %277 = vst [vmem:[%s208_s26 + $0x38] sm:$0xff] %v269_v44 }
  0x98 PF: > { %s13_s14 = sadd.s32 1, %s426_s14   ;;  %s507_s12 = smov %s422_s13 }
  0x99   : > { %p10_p5 = scmp.ge.s32.totalorder %s13_s14, 4   ;;  %s508_s13 = smov %s510_s15 }
  0x9b   :  { %12 = sbr.rel (!%p10_p5) target bundleno = 2 (0x2), region = 62 }

// kernel: dcgan_generator_forward.45
= control target key start
LH: loop header
LB: loop body
LE: loop exit
PB: predicated region body
PF: predicated region fallthrough
CT: control target
= control target key end

     0   :  { %s991_s12 = smov 0   ;;  %s993_s13 = smov 0   ;;  %s1142_s0 = inlined_call_operand.vmem [shape: f32[2,72,1152], index: 0, kind: input, shape index: {}]   ;;  %s1143_s1 = inlined_call_operand.vmem [shape: f32[3,72], index: 1, kind: input, shape index: {}]   ;;  %s1144_s2 = inlined_call_operand.vmem [shape: f32[3,1], index: 2, kind: input, shape index: {}]   ;;  %s1145_s3 = inlined_call_operand.vmem [shape: f32[2,3,1152], index: 3, kind: output, shape index: {}]  }
   0x1   :  { %s995_s14 = smov 0  }
   0x2 LB: > { %s25_s15 = sadd.s32 1, %s961_s13  ;;  %p777_p0 = scmp.ge.s32.totalorder %s965_s14, 1  ;;  %s965_s14 = sphi %s995_s14, %s13_s14   ;;  %s961_s13 = sphi %s993_s13, %s1147_s13   ;;  %s957_s12 = sphi %s991_s12, %s1146_s12  }
   0x3   : > { %p27_p1 = scmp.ge.s32.totalorder %s25_s15, 2  ;;  %p158_p2 = scmp.lt.s32.totalorder %s965_s14, 3 }
   0x5   : > { %s1149_s15 = smov (%p27_p1, %s25_s15), 0  ;;  %p159_p3 = pnand %p777_p0, %p158_p2 }
   0x6   : > { %p191_p4 = scmp.lt.s32.totalorder (!%p159_p3), %s957_s12, 1  ;;  %v967_v0 = vmov (!%p159_p3), 0.0   ;;  %v292_v1 = vld [vmem:[%s1144_s2] sm:$0x7] (!%p159_p3)  ;;  %v968_v2 = vmov (!%p159_p3), 0   ;;  %vm298_vm0 = vcmask (!%p159_p3), 588800  }
   0x7   : > { %162 = sbr.rel (%p159_p3) target bundleno = 301 (0x12d), region = 32  ;;  %366 = vmatprep.mubr.f32.mxu0 (!%p159_p3), %v967_v0  ;;  %437 = vmatprep.mubr.f32.mxu1 (!%p159_p3), %v967_v0  ;;  %v1065_v59 = vld [vmem:[%s1143_s1] sm:$0x7] (!%p159_p3)  ;;  %vm970_vm1 = vmmov (!%p159_p3), 0  }
   0x8   : > { %924 = vset.pattern.permute.xlu0 (!%p159_p3), %v968_v2 }
   0x9   : > { %295 = vperm.xlu0 (!%p159_p3), %924, %v292_v1  }
   0xe   : > { %s1151_s12 = smov (!%p191_p4, %s957_s12), 1 }
   0xf   : > { %s894_s18 = smul.u32 648, %s1151_s12 }
  0x10   : > { %s895_s24 = smul.u32 36, %s1151_s12 }
  0x11   : > { %s1020_s21 = scalar_lea.vmem %s1142_s0, %s894_s18 }
  0x12   : > { %v212_v3 = vld [vmem:[%s1020_s21 + $0x8] sm:$0xff]  ;;  %v221_v4 = vld [vmem:[%s1020_s21 + $0x50] sm:$0xff]  ;;  %v211_v5 = vld [vmem:[%s1020_s21] sm:$0xff]  ;;  %s1126_s27 = scalar_lea.vmem %s1145_s3, %s895_s24 }
  0x13   : > { %v818_v6 = vpack.c.bf16 %v221_v4, %v212_v3  ;;  %v220_v7 = vld [vmem:[%s1020_s21 + $0x48] sm:$0xff]  ;;  %v230_v8 = vld [vmem:[%s1020_s21 + $0x98] sm:$0xff]  ;;  %v239_v9 = vld [vmem:[%s1020_s21 + $0xe0] sm:$0xff] }
  0x14   : > { %v820_v10 = vpack.c.bf16 %v220_v7, %v211_v5  ;;  %v822_v11 = vpack.c.bf16 %v239_v9, %v230_v8  ;;  %v229_v12 = vld [vmem:[%s1020_s21 + $0x90] sm:$0xff]  ;;  %v238_v13 = vld [vmem:[%s1020_s21 + $0xd8] sm:$0xff]  ;;  %v248_v14 = vld [vmem:[%s1020_s21 + $0x128] sm:$0xff] }
  0x15   : > { %819 = vmatprep.subr.bf16.mxu0 %v818_v6  ;;  %v257_v15 = vld [vmem:[%s1020_s21 + $0x170] sm:$0xff]  ;;  %v824_v16 = vpack.c.bf16 %v238_v13, %v229_v12  ;;  %v247_v17 = vld [vmem:[%s1020_s21 + $0x120] sm:$0xff]  ;;  %v256_v18 = vld [vmem:[%s1020_s21 + $0x168] sm:$0xff] }
  0x16   : > { %821 = vmatpush1.bf16.msra.mxu0 %v820_v10  ;;  %v826_v19 = vpack.c.bf16 %v257_v15, %v248_v14  ;;  %v266_v20 = vld [vmem:[%s1020_s21 + $0x1b8] sm:$0xff]  ;;  %v223_v22 = vld [vmem:[%s1020_s21 + $0x60] sm:$0xff]  ;;  %v213_v25 = vld [vmem:[%s1020_s21 + $0x10] sm:$0xff]  ;;  %v828_v30 = vpack.c.bf16 %v256_v18, %v247_v17 }
  0x17   : > { %823 = vmatprep.subr.bf16.mxu0 %v822_v11  ;;  %v214_v21 = vld [vmem:[%s1020_s21 + $0x18] sm:$0xff]  ;;  %v275_v23 = vld [vmem:[%s1020_s21 + $0x200] sm:$0xff]  ;;  %v232_v28 = vld [vmem:[%s1020_s21 + $0xa8] sm:$0xff] }
  0x18   : > { %v834_v24 = vpack.c.bf16 %v223_v22, %v214_v21  ;;  %v222_v26 = vld [vmem:[%s1020_s21 + $0x58] sm:$0xff]  ;;  %v241_v29 = vld [vmem:[%s1020_s21 + $0xf0] sm:$0xff]  ;;  %v231_v32 = vld [vmem:[%s1020_s21 + $0xa0] sm:$0xff]  ;;  %v830_v33 = vpack.c.bf16 %v275_v23, %v266_v20 }
  0x19   : > { %v836_v27 = vpack.c.bf16 %v222_v26, %v213_v25  ;;  %v838_v31 = vpack.c.bf16 %v241_v29, %v232_v28  ;;  %v265_v34 = vld [vmem:[%s1020_s21 + $0x1b0] sm:$0xff]  ;;  %v274_v35 = vld [vmem:[%s1020_s21 + $0x1f8] sm:$0xff]  ;;  %v240_v36 = vld [vmem:[%s1020_s21 + $0xe8] sm:$0xff] }
  0x1a   : > { %825 = vmatpush1.bf16.msra.mxu0 %v824_v16  ;;  %835 = vmatprep.subr.bf16.mxu1 %v834_v24  ;;  %v840_v37 = vpack.c.bf16 %v240_v36, %v231_v32  ;;  %v250_v38 = vld [vmem:[%s1020_s21 + $0x138] sm:$0xff]  ;;  %v259_v39 = vld [vmem:[%s1020_s21 + $0x180] sm:$0xff]  ;;  %v249_v41 = vld [vmem:[%s1020_s21 + $0x130] sm:$0xff]  ;;  %v832_v43 = vpack.c.bf16 %v274_v35, %v265_v34 }
  0x1b   : > { %827 = vmatprep.subr.bf16.mxu0 %v826_v19  ;;  %837 = vmatpush1.bf16.msra.mxu1 %v836_v27  ;;  %v842_v40 = vpack.c.bf16 %v259_v39, %v250_v38  ;;  %v258_v42 = vld [vmem:[%s1020_s21 + $0x178] sm:$0xff]  ;;  %v268_v44 = vld [vmem:[%s1020_s21 + $0x1c8] sm:$0xff]  ;;  %v277_v47 = vld [vmem:[%s1020_s21 + $0x210] sm:$0xff] }
  0x1c   : > { %839 = vmatprep.subr.bf16.mxu1 %v838_v31  ;;  %v284_v45 = vld [vmem:[%s1020_s21 + $0x248] sm:$0xff]  ;;  %v844_v46 = vpack.c.bf16 %v258_v42, %v249_v41  ;;  %v225_v49 = vld [vmem:[%s1020_s21 + $0x70] sm:$0xff]  ;;  %v215_v50 = vld [vmem:[%s1020_s21 + $0x20] sm:$0xff]  ;;  %v846_v51 = vpack.c.bf16 %v277_v47, %v268_v44 }
  0x1d   : > { %v216_v48 = vld [vmem:[%s1020_s21 + $0x28] sm:$0xff]  ;;  %v267_v53 = vld [vmem:[%s1020_s21 + $0x1c0] sm:$0xff]  ;;  %v234_v55 = vld [vmem:[%s1020_s21 + $0xb8] sm:$0xff] }
  0x1e   : > { %829 = vmatpush1.bf16.msra.mxu0 %v828_v30  ;;  %v224_v52 = vld [vmem:[%s1020_s21 + $0x68] sm:$0xff]  ;;  %v243_v56 = vld [vmem:[%s1020_s21 + $0x100] sm:$0xff]  ;;  %v850_v58 = vpack.c.bf16 %v225_v49, %v216_v48  ;;  %v233_v61 = vld [vmem:[%s1020_s21 + $0xb0] sm:$0xff]  ;;  %v969_v48 = vmov 0.0|0.0  }
  0x1f   : > { %831 = vmatprep.subr.bf16.mxu0 %v830_v33  ;;  %841 = vmatpush1.bf16.msra.mxu1 %v840_v37  ;;  %v276_v54 = vld [vmem:[%s1020_s21 + $0x208] sm:$0xff]  ;;  %v283_v57 = vld [vmem:[%s1020_s21 + $0x240] sm:$0xff]  ;;  %v852_v60 = vpack.c.bf16 %v224_v52, %v215_v50  ;;  %v854_v63 = vpack.c.bf16 %v243_v56, %v234_v55  ;;  %v242_v1 = vld [vmem:[%s1020_s21 + $0xf8] sm:$0xff] }
  0x20   : > { %843 = vmatprep.subr.bf16.mxu1 %v842_v40  ;;  %v848_v62 = vpack.c.bf16 %v276_v54, %v267_v53  ;;  %v252_v2 = vld [vmem:[%s1020_s21 + $0x148] sm:$0xff]  ;;  %v261_v3 = vld [vmem:[%s1020_s21 + $0x190] sm:$0xff]  ;;  %v286_v4 = vld [vmem:[%s1020_s21 + $0x258] sm:$0xff]  ;;  %v856_v8 = vpack.c.bf16 %v242_v1, %v233_v61 }
  0x21   : > { %v218_v5 = vld [vmem:[%s1020_s21 + $0x38] sm:$0xff]  ;;  %v227_v6 = vld [vmem:[%s1020_s21 + $0x80] sm:$0xff]  ;;  %v260_v9 = vld [vmem:[%s1020_s21 + $0x188] sm:$0xff]  ;;  %v858_v12 = vpack.c.bf16 %v261_v3, %v252_v2 }
  0x22   : > { %833 = vmatpush1.bf16.msra.mxu0 %v832_v43  ;;  %v251_v7 = vld [vmem:[%s1020_s21 + $0x140] sm:$0xff]  ;;  %v217_v10 = vld [vmem:[%s1020_s21 + $0x30] sm:$0xff]  ;;  %v226_v11 = vld [vmem:[%s1020_s21 + $0x78] sm:$0xff]  ;;  %v866_v14 = vpack.c.bf16 %v227_v6, %v218_v5 }
  0x23   : > { %318 = vmatprep.subr.mxu0 %v284_v45  ;;  %845 = vmatpush1.bf16.msra.mxu1 %v844_v46  ;;  %v285_v13 = vld [vmem:[%s1020_s21 + $0x250] sm:$0xff]  ;;  %v236_v15 = vld [vmem:[%s1020_s21 + $0xc8] sm:$0xff]  ;;  %v270_v17 = vld [vmem:[%s1020_s21 + $0x1d8] sm:$0xff]  ;;  %v868_v19 = vpack.c.bf16 %v226_v11, %v217_v10  ;;  %v860_v20 = vpack.c.bf16 %v260_v9, %v251_v7 }
  0x24   : > { %847 = vmatprep.subr.bf16.mxu1 %v846_v51  ;;  %v245_v16 = vld [vmem:[%s1020_s21 + $0x110] sm:$0xff]  ;;  %v279_v18 = vld [vmem:[%s1020_s21 + $0x220] sm:$0xff]  ;;  %v244_v24 = vld [vmem:[%s1020_s21 + $0x108] sm:$0xff] }
  0x25   : > { %v269_v21 = vld [vmem:[%s1020_s21 + $0x1d0] sm:$0xff]  ;;  %v870_v22 = vpack.c.bf16 %v245_v16, %v236_v15  ;;  %v235_v23 = vld [vmem:[%s1020_s21 + $0xc0] sm:$0xff]  ;;  %v862_v25 = vpack.c.bf16 %v279_v18, %v270_v17  ;;  %v278_v26 = vld [vmem:[%s1020_s21 + $0x218] sm:$0xff] }
  0x26   : > { %319 = vmatpush1.msra.mxu0 %v283_v57  ;;  %v254_v27 = vld [vmem:[%s1020_s21 + $0x158] sm:$0xff]  ;;  %v263_v28 = vld [vmem:[%s1020_s21 + $0x1a0] sm:$0xff]  ;;  %v872_v29 = vpack.c.bf16 %v244_v24, %v235_v23  ;;  %v864_v30 = vpack.c.bf16 %v278_v26, %v269_v21  ;;  %v253_v32 = vld [vmem:[%s1020_s21 + $0x150] sm:$0xff] }
  0x27   : > { %780 = vmatmul.mubr.msk.f32.vlgmr.msra.gmra.mrb[0].mxu0 %vm298_vm0, %v1065_v59  ;;  %851 = vmatprep.subr.bf16.mxu0 %v850_v58  ;;  %v874_v31 = vpack.c.bf16 %v263_v28, %v254_v27  ;;  %v262_v33 = vld [vmem:[%s1020_s21 + $0x198] sm:$0xff]  ;;  %v272_v34 = vld [vmem:[%s1020_s21 + $0x1e8] sm:$0xff]  ;;  %v281_v35 = vld [vmem:[%s1020_s21 + $0x230] sm:$0xff] }
  0x28   : > { %853 = vmatpush1.bf16.msra.mxu0 %v852_v60  ;;  %849 = vmatpush1.bf16.msra.mxu1 %v848_v62  ;;  %v288_v36 = vld [vmem:[%s1020_s21 + $0x268] sm:$0xff]  ;;  %v219_v37 = vld [vmem:[%s1020_s21 + $0x40] sm:$0xff]  ;;  %v876_v39 = vpack.c.bf16 %v262_v33, %v253_v32  ;;  %v878_v40 = vpack.c.bf16 %v281_v35, %v272_v34  ;;  %v237_v45 = vld [vmem:[%s1020_s21 + $0xd0] sm:$0xff] }
  0x29   : > { %855 = vmatprep.subr.bf16.mxu0 %v854_v63  ;;  %389 = vmatprep.subr.mxu1 %v286_v4  ;;  %v228_v38 = vld [vmem:[%s1020_s21 + $0x88] sm:$0xff]  ;;  %v271_v41 = vld [vmem:[%s1020_s21 + $0x1e0] sm:$0xff]  ;;  %v246_v46 = vld [vmem:[%s1020_s21 + $0x118] sm:$0xff] }
  0x2a   : > { %508 = vmatprep.mubr.f32.mxu0 %v967_v0  ;;  %v280_v42 = vld [vmem:[%s1020_s21 + $0x228] sm:$0xff]  ;;  %v287_v43 = vld [vmem:[%s1020_s21 + $0x260] sm:$0xff]  ;;  %v883_v44 = vpack.c.bf16 %v228_v38, %v219_v37  ;;  %v290_v49 = vld [vmem:[%s1020_s21 + $0x278] sm:$0xff]  ;;  %v886_v50 = vpack.c.bf16 %v246_v46, %v237_v45 }
  0x2b   : > { %v880_v47 = vpack.c.bf16 %v280_v42, %v271_v41  ;;  %v255_v51 = vld [vmem:[%s1020_s21 + $0x160] sm:$0xff]  ;;  %v264_v52 = vld [vmem:[%s1020_s21 + $0x1a8] sm:$0xff]  ;;  %v289_v53 = vld [vmem:[%s1020_s21 + $0x270] sm:$0xff] }
  0x2c   : > { %857 = vmatpush1.bf16.msra.mxu0 %v856_v8  ;;  %390 = vmatpush1.msra.mxu1 %v285_v13  ;;  %v889_v54 = vpack.c.bf16 %v264_v52, %v255_v51  ;;  %v273_v55 = vld [vmem:[%s1020_s21 + $0x1f0] sm:$0xff]  ;;  %v282_v56 = vld [vmem:[%s1020_s21 + $0x238] sm:$0xff]  ;;  %v291_v58 = vld [vmem:[%s1020_s21 + $0x280] sm:$0xff] }
  0x2d   : > { %859 = vmatprep.subr.bf16.mxu0 %v858_v12  ;;  %867 = vmatprep.subr.bf16.mxu1 %v866_v14  ;;  %v892_v57 = vpack.c.bf16 %v282_v56, %v273_v55 }
  0x2e   : > { %781 = vmatmul.mubr.msk.f32.vlgmr.msra.gmra.mrb[0].mxu1 %vm298_vm0, %v1065_v59 }
  0x2f   : > { %869 = vmatpush1.bf16.msra.mxu1 %v868_v19  ;;  %579 = vmatprep.mubr.f32.mxu1 %v967_v0 }
  0x30   : > { %861 = vmatpush1.bf16.msra.mxu0 %v860_v20  ;;  %871 = vmatprep.subr.bf16.mxu1 %v870_v22 }
  0x31   : > { %863 = vmatprep.subr.bf16.mxu0 %v862_v25 }
  0x33   : > { %873 = vmatpush1.bf16.msra.mxu1 %v872_v29 }
  0x34   : > { %865 = vmatpush1.bf16.msra.mxu0 %v864_v30  ;;  %875 = vmatprep.subr.bf16.mxu1 %v874_v31 }
  0x35   : > { %460 = vmatprep.subr.mxu0 %v288_v36 }
  0x37   : > { %877 = vmatpush1.bf16.msra.mxu1 %v876_v39 }
  0x38   : > { %461 = vmatpush1.msra.mxu0 %v287_v43  ;;  %879 = vmatprep.subr.bf16.mxu1 %v878_v40 }
  0x39   : > { %782 = vmatmul.mubr.msk.f32.vlgmr.msra.gmra.mrb[2].mxu0 %vm298_vm0, %v1065_v59  ;;  %882 = vmatprep.subr.bf16.mxu0 %v969_v48 }
  0x3a   : > { %884 = vmatpush3.bf16.msra.mxu0 %v883_v44  ;;  %815 = vmatprep.mubr.msk.f32.mxu0 %vm970_vm1, %v967_v0 }
  0x3b   : > { %885 = vmatprep.subr.bf16.mxu0 %v969_v48  ;;  %881 = vmatpush1.bf16.msra.mxu1 %v880_v47 }
  0x3c   : > { %531 = vmatprep.subr.mxu1 %v290_v49 }
  0x3e   : > { %887 = vmatpush3.bf16.msra.mxu0 %v886_v50 }
  0x3f   : > { %888 = vmatprep.subr.bf16.mxu0 %v969_v48  ;;  %532 = vmatpush1.msra.mxu1 %v289_v53 }
  0x40   : > { %783 = vmatmul.mubr.msk.f32.vlgmr.msra.gmra.mrb[2].mxu1 %vm298_vm0, %v1065_v59 }
  0x42   : > { %890 = vmatpush3.bf16.msra.mxu0 %v889_v54 }
  0x43   : > { %891 = vmatprep.subr.bf16.mxu0 %v969_v48 }
  0x46   : > { %893 = vmatpush3.bf16.msra.mxu0 %v892_v57 }
  0x47   : > { %813 = vmatprep.subr.mxu0 %v967_v0 }
  0x4a   : > { %814 = vmatpush3.msra.mxu0 %v291_v58 }
  0x4b   : > { %816 = vmatmul.mubr.msk.f32.vlgmr.msra.gmra.mrb[4].mxu0 %vm298_vm0, %v1065_v59 }
  0x88   : > { %v296_v60 = vpop.permute.xlu0 %295 }
  0xfa   : > { %v368_v61 = vpop.f32.mrb[0].mxu0 }
  0xfb   : > { %v369_v62 = vadd.f32 %v368_v61, %v296_v60  ;;  %v370_v63 = vpop.f32.mrb[1].mxu0 }
  0xfc   : > { %v371_v1 = vadd.f32 %v370_v63, %v296_v60 }
  0xfd   : > { %925 = vtanh.f32 %v369_v62 }
  0xfe   : > { %927 = vtanh.f32 %v371_v1 }
 0x101   : > { %v439_v2 = vpop.f32.mrb[0].mxu1 }
 0x102   : > { %v440_v3 = vadd.f32 %v439_v2, %v296_v60  ;;  %v441_v4 = vpop.f32.mrb[1].mxu1 }
 0x103   : > { %v442_v5 = vadd.f32 %v441_v4, %v296_v60 }
 0x104   : > { %929 = vtanh.f32 %v440_v3 }
 0x105   : > { %931 = vtanh.f32 %v442_v5 }
 0x107   : > { %v926_v0 = vpop.eup %925 }
 0x108   : > { %v928_v6 = vpop.eup %927 }
 0x109   : > { %v673_v59 = vcombine.low %v926_v0, %v928_v6 }
 0x10b   : > { %681 = vst [vmem:[%s1126_s27] sm:$0x77] %v673_v59 }
 0x10c   : > { %v510_v7 = vpop.f32.mrb[2].mxu0 }
 0x10d   : > { %v511_v8 = vadd.f32 %v510_v7, %v296_v60  ;;  %v512_v9 = vpop.f32.mrb[3].mxu0 }
 0x10e   : > { %v930_v10 = vpop.eup %929  ;;  %v513_v11 = vadd.f32 %v512_v9, %v296_v60 }
 0x10f   : > { %v932_v12 = vpop.eup %931  ;;  %933 = vtanh.f32 %v511_v8 }
 0x110   : > { %v674_v13 = vcombine.low %v930_v10, %v932_v12  ;;  %935 = vtanh.f32 %v513_v11 }
 0x112   : > { %682 = vst [vmem:[%s1126_s27 + $0x8] sm:$0x77] %v674_v13 }
 0x113   : > { %v581_v14 = vpop.f32.mrb[2].mxu1 }
 0x114   : > { %v582_v15 = vadd.f32 %v581_v14, %v296_v60  ;;  %v583_v16 = vpop.f32.mrb[3].mxu1 }
 0x115   : > { %v584_v17 = vadd.f32 %v583_v16, %v296_v60 }
 0x116   : > { %937 = vtanh.f32 %v582_v15 }
 0x117   : > { %939 = vtanh.f32 %v584_v17 }
 0x119   : > { %v934_v18 = vpop.eup %933 }
 0x11a   : > { %v936_v19 = vpop.eup %935 }
 0x11b   : > { %v675_v20 = vcombine.low %v934_v18, %v936_v19 }
 0x11d   : > { %683 = vst [vmem:[%s1126_s27 + $0x10] sm:$0x77] %v675_v20 }
 0x11e   : > { %v652_v21 = vpop.f32.mrb[4].mxu0 }
 0x11f   : > { %v653_v22 = vadd.f32 %v652_v21, %v296_v60  ;;  %v817_v23 = vpop.f32.mrb[5].mxu0 }
 0x120   : > { %v938_v24 = vpop.eup %937 }
 0x121   : > { %v940_v25 = vpop.eup %939  ;;  %941 = vtanh.f32 %v653_v22 }
 0x122   : > { %v676_v26 = vcombine.low %v938_v24, %v940_v25 }
 0x124   : > { %684 = vst [vmem:[%s1126_s27 + $0x18] sm:$0x77] %v676_v26 }
 0x12b   : > { %v942_v27 = vpop.eup %941 }
 0x12c   : > { %685 = vst [vmem:[%s1126_s27 + $0x20] sm:$0x7] %v942_v27 }
 0x12d PF: > { %s13_s14 = sadd.s32 1, %s965_s14   ;;  %s1146_s12 = smov %s961_s13 }
 0x12e   : > { %p10_p5 = scmp.ge.s32.totalorder %s13_s14, 4   ;;  %s1147_s13 = smov %s1149_s15 }
 0x130   :  { %12 = sbr.rel (!%p10_p5) target bundleno = 2 (0x2), region = 62 }

</bundles_post_ra>
